<compile_context>
chip_gen: v5e
topology: v5e:2x2
jax: 0.10.0
libtpu: 0.0.40
codegen_flags: <defaults>
</compile_context>

<pallas_src>
import functools

import jax
import jax.numpy as jnp
import numpy as np
from jax import lax
from jax.experimental import pallas as pl
from jax.experimental.pallas import tpu as pltpu


def _cross_attn_kernel(q_ref, kv_ref, wq_ref, wk_ref, wv_ref, wp_ref, bp_ref,
                       o_ref, qs_ref, m_ref, l_ref, acc_ref, *, scale):
    """One (batch, q-tile, kv-tile) grid step.

    Blocks (batch dim squeezed):
      q_ref  : (TN, dim)          kv_ref : (TK, dim)
      wq/wk/wv_ref : (H, dim, hd) wp_ref : (H, hd, C)   bp_ref : (1, C)
      o_ref  : (TN, C)
    Scratch (persists across the kv grid axis):
      qs_ref  : (H, TN, hd)  scaled Q projection (computed once at kv step 0)
      m_ref   : (H, TN, 1)   running row max            (f32)
      l_ref   : (H, TN, 1)   running softmax denominator (f32)
      acc_ref : (H, TN, hd)  running attn @ V accumulator (f32)
    """
    num_heads = qs_ref.shape[0]
    k_step = pl.program_id(2)

    @pl.when(k_step == 0)
    def _init():
        q = q_ref[...]                                   # native dtype
        for h in range(num_heads):
            # Fold the softmax scale into the Q projection (done once).
            qh = jnp.dot(q, wq_ref[h],
                         preferred_element_type=jnp.float32) * scale
            qs_ref[h] = qh.astype(qs_ref.dtype)
        m_ref[...] = jnp.full_like(m_ref, -jnp.inf)
        l_ref[...] = jnp.zeros_like(l_ref)
        acc_ref[...] = jnp.zeros_like(acc_ref)

    kv = kv_ref[...]                                     # (TK, dim), native dtype
    for h in range(num_heads):
        # K/V projections for this kv tile & head: f32 accumulate on the MXU,
        # then back to the input dtype so downstream MXU ops get narrow inputs.
        kh = jnp.dot(kv, wk_ref[h],
                     preferred_element_type=jnp.float32).astype(kv.dtype)
        vh = jnp.dot(kv, wv_ref[h],
                     preferred_element_type=jnp.float32).astype(kv.dtype)

        # Scores: contract the head dim of q and k (no in-kernel transpose).
        s = lax.dot_general(qs_ref[h], kh,
                            dimension_numbers=(((1,), (1,)), ((), ())),
                            preferred_element_type=jnp.float32)   # (TN, TK)

        # Online (flash) softmax update, in f32.
        m_prev = m_ref[h]
        m_new = jnp.maximum(m_prev, jnp.max(s, axis=-1, keepdims=True))
        alpha = jnp.exp(m_prev - m_new)
        p = jnp.exp(s - m_new)
        l_ref[h] = alpha * l_ref[h] + jnp.sum(p, axis=-1, keepdims=True)
        acc_ref[h] = alpha * acc_ref[h] + jnp.dot(
            p.astype(vh.dtype), vh, preferred_element_type=jnp.float32)
        m_ref[h] = m_new

    @pl.when(k_step == pl.num_programs(2) - 1)
    def _finalize():
        # Output projection folded into the per-head accumulation (no concat):
        #   out = bias + sum_h (acc_h / l_h) @ Wp[h*hd:(h+1)*hd, :]
        out = jnp.zeros(o_ref.shape, jnp.float32)
        for h in range(num_heads):
            inv_l = pl.reciprocal(l_ref[h], approx=True)     # EUP slot
            oh = (acc_ref[h] * inv_l).astype(wp_ref.dtype)   # (TN, hd)
            out = out + jnp.dot(oh, wp_ref[h],
                                preferred_element_type=jnp.float32)
        o_ref[...] = (out + bp_ref[...].astype(jnp.float32)).astype(o_ref.dtype)


def _pick_tile(n, cap):
    """Largest tile <= cap that divides n and is a multiple of 8 (sublane
    aligned); falls back to the full extent if no clean tile exists."""
    if n <= cap:
        return n
    for t in range(cap - cap % 8, 7, -8):
        if n % t == 0:
            return t
    return n


def cross_attention(q, v, params, *, num_heads, out_dim, qk_scale=None,
                    block_n=128, block_k=512):
    """q: (B, N, dim), v: (B, NK, dim) -> (B, N, out_dim)."""
    B, N, dim = q.shape
    _, NK, _ = v.shape
    C = out_dim
    hd = C // num_heads
    scale = qk_scale if qk_scale is not None else hd ** (-0.5)

    # Pre-split the weights per head in the wrapper (one-time XLA reshape):
    # the in-kernel head loop then uses clean leading-index slices only.
    wq3 = params["wq"].reshape(dim, num_heads, hd).transpose(1, 0, 2)
    wk3 = params["wk"].reshape(dim, num_heads, hd).transpose(1, 0, 2)
    wv3 = params["wv"].reshape(dim, num_heads, hd).transpose(1, 0, 2)
    wp3 = params["wp"].reshape(num_heads, hd, C)
    bp = params["bp"].reshape(1, C)

    tn = _pick_tile(N, block_n)
    tk = _pick_tile(NK, block_k)
    grid = (B, N // tn, NK // tk)

    kernel = functools.partial(_cross_attn_kernel, scale=scale)
    const3 = lambda b, n, k: (0, 0, 0)

    return pl.pallas_call(
        kernel,
        out_shape=jax.ShapeDtypeStruct((B, N, C), q.dtype),
        grid=grid,
        in_specs=[
            pl.BlockSpec((pl.Squeezed(), tn, dim), lambda b, n, k: (b, n, 0)),  # q
            pl.BlockSpec((pl.Squeezed(), tk, dim), lambda b, n, k: (b, k, 0)),  # v (== k)
            pl.BlockSpec((num_heads, dim, hd), const3),                          # wq3
            pl.BlockSpec((num_heads, dim, hd), const3),                          # wk3
            pl.BlockSpec((num_heads, dim, hd), const3),                          # wv3
            pl.BlockSpec((num_heads, hd, C), const3),                            # wp3
            pl.BlockSpec((1, C), lambda b, n, k: (0, 0)),                        # bp
        ],
        out_specs=pl.BlockSpec((pl.Squeezed(), tn, C), lambda b, n, k: (b, n, 0)),
        scratch_shapes=[
            pltpu.VMEM((num_heads, tn, hd), q.dtype),      # qs (scaled Q proj)
            pltpu.VMEM((num_heads, tn, 1), jnp.float32),   # m (running max)
            pltpu.VMEM((num_heads, tn, 1), jnp.float32),   # l (running denom)
            pltpu.VMEM((num_heads, tn, hd), jnp.float32),  # acc
        ],
        compiler_params=pltpu.CompilerParams(
            dimension_semantics=("parallel", "parallel", "arbitrary"),
            # Above the 16/32 MiB scoped default so larger N/NK tiles fit;
            # still within every chip generation's physical VMEM.
            vmem_limit_bytes=64 * 1024 * 1024),
    )(q, v, wq3, wk3, wv3, wp3, bp)


def cross_attention_ref(q, v, params, *, num_heads, out_dim, qk_scale=None):
    """Pure-JAX reference mirroring the PyTorch forward exactly."""
    B, N, dim = q.shape
    NK = v.shape[1]
    C = out_dim
    hd = C // num_heads
    scale = qk_scale if qk_scale is not None else hd ** (-0.5)

    qp = (q @ params["wq"]).reshape(B, N, num_heads, hd).transpose(0, 2, 1, 3)
    kp = (v @ params["wk"]).reshape(B, NK, num_heads, hd).transpose(0, 2, 1, 3)
    vp = (v @ params["wv"]).reshape(B, NK, num_heads, hd).transpose(0, 2, 1, 3)

    attn = jnp.einsum("bhnd,bhkd->bhnk", qp, kp) * scale
    attn = jax.nn.softmax(attn, axis=-1)
    x = jnp.einsum("bhnk,bhkd->bhnd", attn, vp)
    x = x.transpose(0, 2, 1, 3).reshape(B, N, C)
    x = x @ params["wp"] + params["bp"]
    return x


def init_params(key, dim, out_dim):
    """Deterministic init; weights stored as (in_features, out_features)."""
    k1, k2, k3, k4, k5 = jax.random.split(key, 5)

    def lin(k, fan_in, fan_out):
        bound = 1.0 / np.sqrt(fan_in)
        return jax.random.uniform(k, (fan_in, fan_out), jnp.float32,
                                  -bound, bound)

    return {
        "wq": lin(k1, dim, out_dim),
        "wk": lin(k2, dim, out_dim),
        "wv": lin(k3, dim, out_dim),
        "wp": lin(k4, out_dim, out_dim),
        "bp": jax.random.uniform(k5, (1, out_dim), jnp.float32,
                                 -1.0 / np.sqrt(out_dim),
                                 1.0 / np.sqrt(out_dim)),
    }


if __name__ == "__main__":
    B, N, NK = 2, 8, 16
    dim, out_dim, num_heads = 32, 64, 8

    key = jax.random.PRNGKey(0)
    kq, kv, kp = jax.random.split(key, 3)
    q = jax.random.normal(kq, (B, N, dim), jnp.float32)
    v = jax.random.normal(kv, (B, NK, dim), jnp.float32)
    params = init_params(kp, dim, out_dim)

    out = cross_attention(q, v, params, num_heads=num_heads, out_dim=out_dim)
    out = jax.block_until_ready(out)

    ref = cross_attention_ref(q, v, params, num_heads=num_heads,
                              out_dim=out_dim)
    np.testing.assert_allclose(np.asarray(out), np.asarray(ref),
                               rtol=2e-2, atol=2e-2)
    print("KERNEL_OK")
</pallas_src>

<mosaic_0001>
module attributes {stable_mosaic.version = 11 : i64} {
  func.func @_cross_attn_kernel(%arg0: i32, %arg1: i32, %arg2: i32, %arg3: memref<1x8x32xf32, #tpu.memory_space<vmem>>, %arg4: memref<1x16x32xf32, #tpu.memory_space<vmem>>, %arg5: memref<8x32x8xf32, #tpu.memory_space<vmem>>, %arg6: memref<8x32x8xf32, #tpu.memory_space<vmem>>, %arg7: memref<8x32x8xf32, #tpu.memory_space<vmem>>, %arg8: memref<8x8x64xf32, #tpu.memory_space<vmem>>, %arg9: memref<1x64xf32, #tpu.memory_space<vmem>>, %arg10: memref<1x8x64xf32, #tpu.memory_space<vmem>>, %arg11: memref<8x8x8xf32, #tpu.memory_space<vmem>>, %arg12: memref<8x8x1xf32, #tpu.memory_space<vmem>>, %arg13: memref<8x8x1xf32, #tpu.memory_space<vmem>>, %arg14: memref<8x8x8xf32, #tpu.memory_space<vmem>>) attributes {dimension_semantics = [#tpu.dimension_semantics<parallel>, #tpu.dimension_semantics<parallel>, #tpu.dimension_semantics<arbitrary>], iteration_bounds = array<i64: 2, 1, 1>, scalar_prefetch = 0 : i64, scratch_operands = 4 : i64, tpu.core_type = #tpu.core_type<tc>, window_params = [{transform_indices = @transform_0, window_bounds = array<i64: 1, 8, 32>}, {transform_indices = @transform_1, window_bounds = array<i64: 1, 16, 32>}, {pipeline_mode = #tpu.pipeline_mode<synchronous>, transform_indices = @transform_2, window_bounds = array<i64: 8, 32, 8>}, {pipeline_mode = #tpu.pipeline_mode<synchronous>, transform_indices = @transform_3, window_bounds = array<i64: 8, 32, 8>}, {pipeline_mode = #tpu.pipeline_mode<synchronous>, transform_indices = @transform_4, window_bounds = array<i64: 8, 32, 8>}, {pipeline_mode = #tpu.pipeline_mode<synchronous>, transform_indices = @transform_5, window_bounds = array<i64: 8, 8, 64>}, {pipeline_mode = #tpu.pipeline_mode<synchronous>, transform_indices = @transform_6, window_bounds = array<i64: 1, 64>}, {transform_indices = @transform_7, window_bounds = array<i64: 1, 8, 64>}]} {
    %c0_i32 = arith.constant 0 : i32
    %0 = arith.cmpi eq, %arg2, %c0_i32 : i32
    %1 = arith.extui %0 : i1 to i32
    %c0_i32_0 = arith.constant 0 : i32
    %2 = arith.cmpi ne, %1, %c0_i32_0 : i32
    scf.if %2 {
      %c0_261 = arith.constant 0 : index
      %c0_262 = arith.constant 0 : index
      %c0_263 = arith.constant 0 : index
      %328 = vector.load %arg3[%c0_261, %c0_262, %c0_263] : memref<1x8x32xf32, #tpu.memory_space<vmem>>, vector<1x8x32xf32>
      %329 = vector.shape_cast %328 : vector<1x8x32xf32> to vector<8x32xf32>
      %c0_264 = arith.constant 0 : index
      %c0_265 = arith.constant 0 : index
      %c0_266 = arith.constant 0 : index
      %330 = vector.load %arg5[%c0_264, %c0_265, %c0_266] : memref<8x32x8xf32, #tpu.memory_space<vmem>>, vector<1x32x8xf32>
      %331 = vector.shape_cast %330 : vector<1x32x8xf32> to vector<32x8xf32>
      %cst_267 = arith.constant dense<0.000000e+00> : vector<8x8xf32>
      %332 = tpu.matmul %329, %331, %cst_267 {dimension_numbers = #tpu.dot_dimension_numbers<[1], [0], [0], [1], [0, 0, 1, 1], [], []>} : vector<8x32xf32>, vector<32x8xf32>, vector<8x8xf32> -> vector<8x8xf32>
      %cst_268 = arith.constant 0.353553385 : f32
      %333 = vector.broadcast %cst_268 : f32 to vector<8x8xf32>
      %334 = arith.mulf %332, %333 : vector<8x8xf32>
      %c0_269 = arith.constant 0 : index
      %c0_270 = arith.constant 0 : index
      %c0_271 = arith.constant 0 : index
      %335 = vector.load %arg11[%c0_269, %c0_270, %c0_271] : memref<8x8x8xf32, #tpu.memory_space<vmem>>, vector<1x8x8xf32>
      %336 = vector.shape_cast %335 : vector<1x8x8xf32> to vector<8x8xf32>
      %337 = vector.shape_cast %334 : vector<8x8xf32> to vector<1x8x8xf32>
      tpu.vector_store %arg11[%c0_269, %c0_270, %c0_271], %337 {strides = array<i32>} : memref<8x8x8xf32, #tpu.memory_space<vmem>>, vector<1x8x8xf32>,
      %c1_272 = arith.constant 1 : index
      %c0_273 = arith.constant 0 : index
      %c0_274 = arith.constant 0 : index
      %338 = vector.load %arg5[%c1_272, %c0_273, %c0_274] : memref<8x32x8xf32, #tpu.memory_space<vmem>>, vector<1x32x8xf32>
      %339 = vector.shape_cast %338 : vector<1x32x8xf32> to vector<32x8xf32>
      %cst_275 = arith.constant dense<0.000000e+00> : vector<8x8xf32>
      %340 = tpu.matmul %329, %339, %cst_275 {dimension_numbers = #tpu.dot_dimension_numbers<[1], [0], [0], [1], [0, 0, 1, 1], [], []>} : vector<8x32xf32>, vector<32x8xf32>, vector<8x8xf32> -> vector<8x8xf32>
      %cst_276 = arith.constant 0.353553385 : f32
      %341 = vector.broadcast %cst_276 : f32 to vector<8x8xf32>
      %342 = arith.mulf %340, %341 : vector<8x8xf32>
      %c1_277 = arith.constant 1 : index
      %c0_278 = arith.constant 0 : index
      %c0_279 = arith.constant 0 : index
      %343 = vector.load %arg11[%c1_277, %c0_278, %c0_279] : memref<8x8x8xf32, #tpu.memory_space<vmem>>, vector<1x8x8xf32>
      %344 = vector.shape_cast %343 : vector<1x8x8xf32> to vector<8x8xf32>
      %345 = vector.shape_cast %342 : vector<8x8xf32> to vector<1x8x8xf32>
      tpu.vector_store %arg11[%c1_277, %c0_278, %c0_279], %345 {strides = array<i32>} : memref<8x8x8xf32, #tpu.memory_space<vmem>>, vector<1x8x8xf32>,
      %c2_280 = arith.constant 2 : index
      %c0_281 = arith.constant 0 : index
      %c0_282 = arith.constant 0 : index
      %346 = vector.load %arg5[%c2_280, %c0_281, %c0_282] : memref<8x32x8xf32, #tpu.memory_space<vmem>>, vector<1x32x8xf32>
      %347 = vector.shape_cast %346 : vector<1x32x8xf32> to vector<32x8xf32>
      %cst_283 = arith.constant dense<0.000000e+00> : vector<8x8xf32>
      %348 = tpu.matmul %329, %347, %cst_283 {dimension_numbers = #tpu.dot_dimension_numbers<[1], [0], [0], [1], [0, 0, 1, 1], [], []>} : vector<8x32xf32>, vector<32x8xf32>, vector<8x8xf32> -> vector<8x8xf32>
      %cst_284 = arith.constant 0.353553385 : f32
      %349 = vector.broadcast %cst_284 : f32 to vector<8x8xf32>
      %350 = arith.mulf %348, %349 : vector<8x8xf32>
      %c2_285 = arith.constant 2 : index
      %c0_286 = arith.constant 0 : index
      %c0_287 = arith.constant 0 : index
      %351 = vector.load %arg11[%c2_285, %c0_286, %c0_287] : memref<8x8x8xf32, #tpu.memory_space<vmem>>, vector<1x8x8xf32>
      %352 = vector.shape_cast %351 : vector<1x8x8xf32> to vector<8x8xf32>
      %353 = vector.shape_cast %350 : vector<8x8xf32> to vector<1x8x8xf32>
      tpu.vector_store %arg11[%c2_285, %c0_286, %c0_287], %353 {strides = array<i32>} : memref<8x8x8xf32, #tpu.memory_space<vmem>>, vector<1x8x8xf32>,
      %c3_288 = arith.constant 3 : index
      %c0_289 = arith.constant 0 : index
      %c0_290 = arith.constant 0 : index
      %354 = vector.load %arg5[%c3_288, %c0_289, %c0_290] : memref<8x32x8xf32, #tpu.memory_space<vmem>>, vector<1x32x8xf32>
      %355 = vector.shape_cast %354 : vector<1x32x8xf32> to vector<32x8xf32>
      %cst_291 = arith.constant dense<0.000000e+00> : vector<8x8xf32>
      %356 = tpu.matmul %329, %355, %cst_291 {dimension_numbers = #tpu.dot_dimension_numbers<[1], [0], [0], [1], [0, 0, 1, 1], [], []>} : vector<8x32xf32>, vector<32x8xf32>, vector<8x8xf32> -> vector<8x8xf32>
      %cst_292 = arith.constant 0.353553385 : f32
      %357 = vector.broadcast %cst_292 : f32 to vector<8x8xf32>
      %358 = arith.mulf %356, %357 : vector<8x8xf32>
      %c3_293 = arith.constant 3 : index
      %c0_294 = arith.constant 0 : index
      %c0_295 = arith.constant 0 : index
      %359 = vector.load %arg11[%c3_293, %c0_294, %c0_295] : memref<8x8x8xf32, #tpu.memory_space<vmem>>, vector<1x8x8xf32>
      %360 = vector.shape_cast %359 : vector<1x8x8xf32> to vector<8x8xf32>
      %361 = vector.shape_cast %358 : vector<8x8xf32> to vector<1x8x8xf32>
      tpu.vector_store %arg11[%c3_293, %c0_294, %c0_295], %361 {strides = array<i32>} : memref<8x8x8xf32, #tpu.memory_space<vmem>>, vector<1x8x8xf32>,
      %c4_296 = arith.constant 4 : index
      %c0_297 = arith.constant 0 : index
      %c0_298 = arith.constant 0 : index
      %362 = vector.load %arg5[%c4_296, %c0_297, %c0_298] : memref<8x32x8xf32, #tpu.memory_space<vmem>>, vector<1x32x8xf32>
      %363 = vector.shape_cast %362 : vector<1x32x8xf32> to vector<32x8xf32>
      %cst_299 = arith.constant dense<0.000000e+00> : vector<8x8xf32>
      %364 = tpu.matmul %329, %363, %cst_299 {dimension_numbers = #tpu.dot_dimension_numbers<[1], [0], [0], [1], [0, 0, 1, 1], [], []>} : vector<8x32xf32>, vector<32x8xf32>, vector<8x8xf32> -> vector<8x8xf32>
      %cst_300 = arith.constant 0.353553385 : f32
      %365 = vector.broadcast %cst_300 : f32 to vector<8x8xf32>
      %366 = arith.mulf %364, %365 : vector<8x8xf32>
      %c4_301 = arith.constant 4 : index
      %c0_302 = arith.constant 0 : index
      %c0_303 = arith.constant 0 : index
      %367 = vector.load %arg11[%c4_301, %c0_302, %c0_303] : memref<8x8x8xf32, #tpu.memory_space<vmem>>, vector<1x8x8xf32>
      %368 = vector.shape_cast %367 : vector<1x8x8xf32> to vector<8x8xf32>
      %369 = vector.shape_cast %366 : vector<8x8xf32> to vector<1x8x8xf32>
      tpu.vector_store %arg11[%c4_301, %c0_302, %c0_303], %369 {strides = array<i32>} : memref<8x8x8xf32, #tpu.memory_space<vmem>>, vector<1x8x8xf32>,
      %c5_304 = arith.constant 5 : index
      %c0_305 = arith.constant 0 : index
      %c0_306 = arith.constant 0 : index
      %370 = vector.load %arg5[%c5_304, %c0_305, %c0_306] : memref<8x32x8xf32, #tpu.memory_space<vmem>>, vector<1x32x8xf32>
      %371 = vector.shape_cast %370 : vector<1x32x8xf32> to vector<32x8xf32>
      %cst_307 = arith.constant dense<0.000000e+00> : vector<8x8xf32>
      %372 = tpu.matmul %329, %371, %cst_307 {dimension_numbers = #tpu.dot_dimension_numbers<[1], [0], [0], [1], [0, 0, 1, 1], [], []>} : vector<8x32xf32>, vector<32x8xf32>, vector<8x8xf32> -> vector<8x8xf32>
      %cst_308 = arith.constant 0.353553385 : f32
      %373 = vector.broadcast %cst_308 : f32 to vector<8x8xf32>
      %374 = arith.mulf %372, %373 : vector<8x8xf32>
      %c5_309 = arith.constant 5 : index
      %c0_310 = arith.constant 0 : index
      %c0_311 = arith.constant 0 : index
      %375 = vector.load %arg11[%c5_309, %c0_310, %c0_311] : memref<8x8x8xf32, #tpu.memory_space<vmem>>, vector<1x8x8xf32>
      %376 = vector.shape_cast %375 : vector<1x8x8xf32> to vector<8x8xf32>
      %377 = vector.shape_cast %374 : vector<8x8xf32> to vector<1x8x8xf32>
      tpu.vector_store %arg11[%c5_309, %c0_310, %c0_311], %377 {strides = array<i32>} : memref<8x8x8xf32, #tpu.memory_space<vmem>>, vector<1x8x8xf32>,
      %c6_312 = arith.constant 6 : index
      %c0_313 = arith.constant 0 : index
      %c0_314 = arith.constant 0 : index
      %378 = vector.load %arg5[%c6_312, %c0_313, %c0_314] : memref<8x32x8xf32, #tpu.memory_space<vmem>>, vector<1x32x8xf32>
      %379 = vector.shape_cast %378 : vector<1x32x8xf32> to vector<32x8xf32>
      %cst_315 = arith.constant dense<0.000000e+00> : vector<8x8xf32>
      %380 = tpu.matmul %329, %379, %cst_315 {dimension_numbers = #tpu.dot_dimension_numbers<[1], [0], [0], [1], [0, 0, 1, 1], [], []>} : vector<8x32xf32>, vector<32x8xf32>, vector<8x8xf32> -> vector<8x8xf32>
      %cst_316 = arith.constant 0.353553385 : f32
      %381 = vector.broadcast %cst_316 : f32 to vector<8x8xf32>
      %382 = arith.mulf %380, %381 : vector<8x8xf32>
      %c6_317 = arith.constant 6 : index
      %c0_318 = arith.constant 0 : index
      %c0_319 = arith.constant 0 : index
      %383 = vector.load %arg11[%c6_317, %c0_318, %c0_319] : memref<8x8x8xf32, #tpu.memory_space<vmem>>, vector<1x8x8xf32>
      %384 = vector.shape_cast %383 : vector<1x8x8xf32> to vector<8x8xf32>
      %385 = vector.shape_cast %382 : vector<8x8xf32> to vector<1x8x8xf32>
      tpu.vector_store %arg11[%c6_317, %c0_318, %c0_319], %385 {strides = array<i32>} : memref<8x8x8xf32, #tpu.memory_space<vmem>>, vector<1x8x8xf32>,
      %c7_320 = arith.constant 7 : index
      %c0_321 = arith.constant 0 : index
      %c0_322 = arith.constant 0 : index
      %386 = vector.load %arg5[%c7_320, %c0_321, %c0_322] : memref<8x32x8xf32, #tpu.memory_space<vmem>>, vector<1x32x8xf32>
      %387 = vector.shape_cast %386 : vector<1x32x8xf32> to vector<32x8xf32>
      %cst_323 = arith.constant dense<0.000000e+00> : vector<8x8xf32>
      %388 = tpu.matmul %329, %387, %cst_323 {dimension_numbers = #tpu.dot_dimension_numbers<[1], [0], [0], [1], [0, 0, 1, 1], [], []>} : vector<8x32xf32>, vector<32x8xf32>, vector<8x8xf32> -> vector<8x8xf32>
      %cst_324 = arith.constant 0.353553385 : f32
      %389 = vector.broadcast %cst_324 : f32 to vector<8x8xf32>
      %390 = arith.mulf %388, %389 : vector<8x8xf32>
      %c7_325 = arith.constant 7 : index
      %c0_326 = arith.constant 0 : index
      %c0_327 = arith.constant 0 : index
      %391 = vector.load %arg11[%c7_325, %c0_326, %c0_327] : memref<8x8x8xf32, #tpu.memory_space<vmem>>, vector<1x8x8xf32>
      %392 = vector.shape_cast %391 : vector<1x8x8xf32> to vector<8x8xf32>
      %393 = vector.shape_cast %390 : vector<8x8xf32> to vector<1x8x8xf32>
      tpu.vector_store %arg11[%c7_325, %c0_326, %c0_327], %393 {strides = array<i32>} : memref<8x8x8xf32, #tpu.memory_space<vmem>>, vector<1x8x8xf32>,
      %cst_328 = arith.constant 0xFF800000 : f32
      %394 = vector.broadcast %cst_328 : f32 to vector<8x8x1xf32>
      %c0_329 = arith.constant 0 : index
      %c0_330 = arith.constant 0 : index
      %c0_331 = arith.constant 0 : index
      %395 = vector.load %arg12[%c0_329, %c0_330, %c0_331] : memref<8x8x1xf32, #tpu.memory_space<vmem>>, vector<8x8x1xf32>
      tpu.vector_store %arg12[%c0_329, %c0_330, %c0_331], %394 {strides = array<i32>} : memref<8x8x1xf32, #tpu.memory_space<vmem>>, vector<8x8x1xf32>,
      %cst_332 = arith.constant 0.000000e+00 : f32
      %396 = vector.broadcast %cst_332 : f32 to vector<8x8x1xf32>
      %c0_333 = arith.constant 0 : index
      %c0_334 = arith.constant 0 : index
      %c0_335 = arith.constant 0 : index
      %397 = vector.load %arg13[%c0_333, %c0_334, %c0_335] : memref<8x8x1xf32, #tpu.memory_space<vmem>>, vector<8x8x1xf32>
      tpu.vector_store %arg13[%c0_333, %c0_334, %c0_335], %396 {strides = array<i32>} : memref<8x8x1xf32, #tpu.memory_space<vmem>>, vector<8x8x1xf32>,
      %cst_336 = arith.constant 0.000000e+00 : f32
      %398 = vector.broadcast %cst_336 : f32 to vector<8x8x8xf32>
      %c0_337 = arith.constant 0 : index
      %c0_338 = arith.constant 0 : index
      %c0_339 = arith.constant 0 : index
      %399 = vector.load %arg14[%c0_337, %c0_338, %c0_339] : memref<8x8x8xf32, #tpu.memory_space<vmem>>, vector<8x8x8xf32>
      tpu.vector_store %arg14[%c0_337, %c0_338, %c0_339], %398 {strides = array<i32>} : memref<8x8x8xf32, #tpu.memory_space<vmem>>, vector<8x8x8xf32>,
    } else {
    }
    %c0 = arith.constant 0 : index
    %c0_1 = arith.constant 0 : index
    %c0_2 = arith.constant 0 : index
    %3 = vector.load %arg4[%c0, %c0_1, %c0_2] : memref<1x16x32xf32, #tpu.memory_space<vmem>>, vector<1x16x32xf32>
    %4 = vector.shape_cast %3 : vector<1x16x32xf32> to vector<16x32xf32>
    %c0_3 = arith.constant 0 : index
    %c0_4 = arith.constant 0 : index
    %c0_5 = arith.constant 0 : index
    %5 = vector.load %arg6[%c0_3, %c0_4, %c0_5] : memref<8x32x8xf32, #tpu.memory_space<vmem>>, vector<1x32x8xf32>
    %6 = vector.shape_cast %5 : vector<1x32x8xf32> to vector<32x8xf32>
    %cst = arith.constant dense<0.000000e+00> : vector<16x8xf32>
    %7 = tpu.matmul %4, %6, %cst {dimension_numbers = #tpu.dot_dimension_numbers<[1], [0], [0], [1], [0, 0, 1, 1], [], []>} : vector<16x32xf32>, vector<32x8xf32>, vector<16x8xf32> -> vector<16x8xf32>
    %c0_6 = arith.constant 0 : index
    %c0_7 = arith.constant 0 : index
    %c0_8 = arith.constant 0 : index
    %8 = vector.load %arg7[%c0_6, %c0_7, %c0_8] : memref<8x32x8xf32, #tpu.memory_space<vmem>>, vector<1x32x8xf32>
    %9 = vector.shape_cast %8 : vector<1x32x8xf32> to vector<32x8xf32>
    %cst_9 = arith.constant dense<0.000000e+00> : vector<16x8xf32>
    %10 = tpu.matmul %4, %9, %cst_9 {dimension_numbers = #tpu.dot_dimension_numbers<[1], [0], [0], [1], [0, 0, 1, 1], [], []>} : vector<16x32xf32>, vector<32x8xf32>, vector<16x8xf32> -> vector<16x8xf32>
    %c0_10 = arith.constant 0 : index
    %c0_11 = arith.constant 0 : index
    %c0_12 = arith.constant 0 : index
    %11 = vector.load %arg11[%c0_10, %c0_11, %c0_12] : memref<8x8x8xf32, #tpu.memory_space<vmem>>, vector<1x8x8xf32>
    %12 = vector.shape_cast %11 : vector<1x8x8xf32> to vector<8x8xf32>
    %cst_13 = arith.constant dense<0.000000e+00> : vector<8x16xf32>
    %13 = tpu.matmul %12, %7, %cst_13 {dimension_numbers = #tpu.dot_dimension_numbers<[1], [1], [0], [0], [0, 0, 1, 0], [], []>} : vector<8x8xf32>, vector<16x8xf32>, vector<8x16xf32> -> vector<8x16xf32>
    %c0_14 = arith.constant 0 : index
    %c0_15 = arith.constant 0 : index
    %c0_16 = arith.constant 0 : index
    %14 = vector.load %arg12[%c0_14, %c0_15, %c0_16] : memref<8x8x1xf32, #tpu.memory_space<vmem>>, vector<1x8x1xf32>
    %15 = vector.shape_cast %14 : vector<1x8x1xf32> to vector<8x1xf32>
    %cst_17 = arith.constant dense<0xFF800000> : vector<8xf32>
    %16 = vector.multi_reduction <maximumf>, %13, %cst_17 [1] : vector<8x16xf32> to vector<8xf32>
    %17 = vector.shape_cast %16 : vector<8xf32> to vector<8x1xf32>
    %18 = arith.maximumf %15, %17 : vector<8x1xf32>
    %19 = arith.subf %15, %18 : vector<8x1xf32>
    %20 = math.exp %19 : vector<8x1xf32>
    %21 = vector.broadcast %18 : vector<8x1xf32> to vector<8x16xf32>
    %22 = arith.subf %13, %21 : vector<8x16xf32>
    %23 = math.exp %22 : vector<8x16xf32>
    %c0_18 = arith.constant 0 : index
    %c0_19 = arith.constant 0 : index
    %c0_20 = arith.constant 0 : index
    %24 = vector.load %arg13[%c0_18, %c0_19, %c0_20] : memref<8x8x1xf32, #tpu.memory_space<vmem>>, vector<1x8x1xf32>
    %25 = vector.shape_cast %24 : vector<1x8x1xf32> to vector<8x1xf32>
    %26 = arith.mulf %20, %25 : vector<8x1xf32>
    %cst_21 = arith.constant dense<0.000000e+00> : vector<8xf32>
    %27 = vector.multi_reduction <add>, %23, %cst_21 [1] : vector<8x16xf32> to vector<8xf32>
    %28 = vector.shape_cast %27 : vector<8xf32> to vector<8x1xf32>
    %29 = arith.addf %26, %28 : vector<8x1xf32>
    %c0_22 = arith.constant 0 : index
    %c0_23 = arith.constant 0 : index
    %c0_24 = arith.constant 0 : index
    %30 = vector.load %arg13[%c0_22, %c0_23, %c0_24] : memref<8x8x1xf32, #tpu.memory_space<vmem>>, vector<1x8x1xf32>
    %31 = vector.shape_cast %30 : vector<1x8x1xf32> to vector<8x1xf32>
    %32 = vector.shape_cast %29 : vector<8x1xf32> to vector<1x8x1xf32>
    tpu.vector_store %arg13[%c0_22, %c0_23, %c0_24], %32 {strides = array<i32>} : memref<8x8x1xf32, #tpu.memory_space<vmem>>, vector<1x8x1xf32>,
    %c0_25 = arith.constant 0 : index
    %c0_26 = arith.constant 0 : index
    %c0_27 = arith.constant 0 : index
    %33 = vector.load %arg14[%c0_25, %c0_26, %c0_27] : memref<8x8x8xf32, #tpu.memory_space<vmem>>, vector<1x8x8xf32>
    %34 = vector.shape_cast %33 : vector<1x8x8xf32> to vector<8x8xf32>
    %35 = vector.broadcast %20 : vector<8x1xf32> to vector<8x8xf32>
    %36 = arith.mulf %35, %34 : vector<8x8xf32>
    %cst_28 = arith.constant dense<0.000000e+00> : vector<8x8xf32>
    %37 = tpu.matmul %23, %10, %cst_28 {dimension_numbers = #tpu.dot_dimension_numbers<[1], [0], [0], [1], [0, 0, 1, 1], [], []>} : vector<8x16xf32>, vector<16x8xf32>, vector<8x8xf32> -> vector<8x8xf32>
    %38 = arith.addf %36, %37 : vector<8x8xf32>
    %c0_29 = arith.constant 0 : index
    %c0_30 = arith.constant 0 : index
    %c0_31 = arith.constant 0 : index
    %39 = vector.load %arg14[%c0_29, %c0_30, %c0_31] : memref<8x8x8xf32, #tpu.memory_space<vmem>>, vector<1x8x8xf32>
    %40 = vector.shape_cast %39 : vector<1x8x8xf32> to vector<8x8xf32>
    %41 = vector.shape_cast %38 : vector<8x8xf32> to vector<1x8x8xf32>
    tpu.vector_store %arg14[%c0_29, %c0_30, %c0_31], %41 {strides = array<i32>} : memref<8x8x8xf32, #tpu.memory_space<vmem>>, vector<1x8x8xf32>,
    %c0_32 = arith.constant 0 : index
    %c0_33 = arith.constant 0 : index
    %c0_34 = arith.constant 0 : index
    %42 = vector.load %arg12[%c0_32, %c0_33, %c0_34] : memref<8x8x1xf32, #tpu.memory_space<vmem>>, vector<1x8x1xf32>
    %43 = vector.shape_cast %42 : vector<1x8x1xf32> to vector<8x1xf32>
    %44 = vector.shape_cast %18 : vector<8x1xf32> to vector<1x8x1xf32>
    tpu.vector_store %arg12[%c0_32, %c0_33, %c0_34], %44 {strides = array<i32>} : memref<8x8x1xf32, #tpu.memory_space<vmem>>, vector<1x8x1xf32>,
    %c1 = arith.constant 1 : index
    %c0_35 = arith.constant 0 : index
    %c0_36 = arith.constant 0 : index
    %45 = vector.load %arg6[%c1, %c0_35, %c0_36] : memref<8x32x8xf32, #tpu.memory_space<vmem>>, vector<1x32x8xf32>
    %46 = vector.shape_cast %45 : vector<1x32x8xf32> to vector<32x8xf32>
    %cst_37 = arith.constant dense<0.000000e+00> : vector<16x8xf32>
    %47 = tpu.matmul %4, %46, %cst_37 {dimension_numbers = #tpu.dot_dimension_numbers<[1], [0], [0], [1], [0, 0, 1, 1], [], []>} : vector<16x32xf32>, vector<32x8xf32>, vector<16x8xf32> -> vector<16x8xf32>
    %c1_38 = arith.constant 1 : index
    %c0_39 = arith.constant 0 : index
    %c0_40 = arith.constant 0 : index
    %48 = vector.load %arg7[%c1_38, %c0_39, %c0_40] : memref<8x32x8xf32, #tpu.memory_space<vmem>>, vector<1x32x8xf32>
    %49 = vector.shape_cast %48 : vector<1x32x8xf32> to vector<32x8xf32>
    %cst_41 = arith.constant dense<0.000000e+00> : vector<16x8xf32>
    %50 = tpu.matmul %4, %49, %cst_41 {dimension_numbers = #tpu.dot_dimension_numbers<[1], [0], [0], [1], [0, 0, 1, 1], [], []>} : vector<16x32xf32>, vector<32x8xf32>, vector<16x8xf32> -> vector<16x8xf32>
    %c1_42 = arith.constant 1 : index
    %c0_43 = arith.constant 0 : index
    %c0_44 = arith.constant 0 : index
    %51 = vector.load %arg11[%c1_42, %c0_43, %c0_44] : memref<8x8x8xf32, #tpu.memory_space<vmem>>, vector<1x8x8xf32>
    %52 = vector.shape_cast %51 : vector<1x8x8xf32> to vector<8x8xf32>
    %cst_45 = arith.constant dense<0.000000e+00> : vector<8x16xf32>
    %53 = tpu.matmul %52, %47, %cst_45 {dimension_numbers = #tpu.dot_dimension_numbers<[1], [1], [0], [0], [0, 0, 1, 0], [], []>} : vector<8x8xf32>, vector<16x8xf32>, vector<8x16xf32> -> vector<8x16xf32>
    %c1_46 = arith.constant 1 : index
    %c0_47 = arith.constant 0 : index
    %c0_48 = arith.constant 0 : index
    %54 = vector.load %arg12[%c1_46, %c0_47, %c0_48] : memref<8x8x1xf32, #tpu.memory_space<vmem>>, vector<1x8x1xf32>
    %55 = vector.shape_cast %54 : vector<1x8x1xf32> to vector<8x1xf32>
    %cst_49 = arith.constant dense<0xFF800000> : vector<8xf32>
    %56 = vector.multi_reduction <maximumf>, %53, %cst_49 [1] : vector<8x16xf32> to vector<8xf32>
    %57 = vector.shape_cast %56 : vector<8xf32> to vector<8x1xf32>
    %58 = arith.maximumf %55, %57 : vector<8x1xf32>
    %59 = arith.subf %55, %58 : vector<8x1xf32>
    %60 = math.exp %59 : vector<8x1xf32>
    %61 = vector.broadcast %58 : vector<8x1xf32> to vector<8x16xf32>
    %62 = arith.subf %53, %61 : vector<8x16xf32>
    %63 = math.exp %62 : vector<8x16xf32>
    %c1_50 = arith.constant 1 : index
    %c0_51 = arith.constant 0 : index
    %c0_52 = arith.constant 0 : index
    %64 = vector.load %arg13[%c1_50, %c0_51, %c0_52] : memref<8x8x1xf32, #tpu.memory_space<vmem>>, vector<1x8x1xf32>
    %65 = vector.shape_cast %64 : vector<1x8x1xf32> to vector<8x1xf32>
    %66 = arith.mulf %60, %65 : vector<8x1xf32>
    %cst_53 = arith.constant dense<0.000000e+00> : vector<8xf32>
    %67 = vector.multi_reduction <add>, %63, %cst_53 [1] : vector<8x16xf32> to vector<8xf32>
    %68 = vector.shape_cast %67 : vector<8xf32> to vector<8x1xf32>
    %69 = arith.addf %66, %68 : vector<8x1xf32>
    %c1_54 = arith.constant 1 : index
    %c0_55 = arith.constant 0 : index
    %c0_56 = arith.constant 0 : index
    %70 = vector.load %arg13[%c1_54, %c0_55, %c0_56] : memref<8x8x1xf32, #tpu.memory_space<vmem>>, vector<1x8x1xf32>
    %71 = vector.shape_cast %70 : vector<1x8x1xf32> to vector<8x1xf32>
    %72 = vector.shape_cast %69 : vector<8x1xf32> to vector<1x8x1xf32>
    tpu.vector_store %arg13[%c1_54, %c0_55, %c0_56], %72 {strides = array<i32>} : memref<8x8x1xf32, #tpu.memory_space<vmem>>, vector<1x8x1xf32>,
    %c1_57 = arith.constant 1 : index
    %c0_58 = arith.constant 0 : index
    %c0_59 = arith.constant 0 : index
    %73 = vector.load %arg14[%c1_57, %c0_58, %c0_59] : memref<8x8x8xf32, #tpu.memory_space<vmem>>, vector<1x8x8xf32>
    %74 = vector.shape_cast %73 : vector<1x8x8xf32> to vector<8x8xf32>
    %75 = vector.broadcast %60 : vector<8x1xf32> to vector<8x8xf32>
    %76 = arith.mulf %75, %74 : vector<8x8xf32>
    %cst_60 = arith.constant dense<0.000000e+00> : vector<8x8xf32>
    %77 = tpu.matmul %63, %50, %cst_60 {dimension_numbers = #tpu.dot_dimension_numbers<[1], [0], [0], [1], [0, 0, 1, 1], [], []>} : vector<8x16xf32>, vector<16x8xf32>, vector<8x8xf32> -> vector<8x8xf32>
    %78 = arith.addf %76, %77 : vector<8x8xf32>
    %c1_61 = arith.constant 1 : index
    %c0_62 = arith.constant 0 : index
    %c0_63 = arith.constant 0 : index
    %79 = vector.load %arg14[%c1_61, %c0_62, %c0_63] : memref<8x8x8xf32, #tpu.memory_space<vmem>>, vector<1x8x8xf32>
    %80 = vector.shape_cast %79 : vector<1x8x8xf32> to vector<8x8xf32>
    %81 = vector.shape_cast %78 : vector<8x8xf32> to vector<1x8x8xf32>
    tpu.vector_store %arg14[%c1_61, %c0_62, %c0_63], %81 {strides = array<i32>} : memref<8x8x8xf32, #tpu.memory_space<vmem>>, vector<1x8x8xf32>,
    %c1_64 = arith.constant 1 : index
    %c0_65 = arith.constant 0 : index
    %c0_66 = arith.constant 0 : index
    %82 = vector.load %arg12[%c1_64, %c0_65, %c0_66] : memref<8x8x1xf32, #tpu.memory_space<vmem>>, vector<1x8x1xf32>
    %83 = vector.shape_cast %82 : vector<1x8x1xf32> to vector<8x1xf32>
    %84 = vector.shape_cast %58 : vector<8x1xf32> to vector<1x8x1xf32>
    tpu.vector_store %arg12[%c1_64, %c0_65, %c0_66], %84 {strides = array<i32>} : memref<8x8x1xf32, #tpu.memory_space<vmem>>, vector<1x8x1xf32>,
    %c2 = arith.constant 2 : index
    %c0_67 = arith.constant 0 : index
    %c0_68 = arith.constant 0 : index
    %85 = vector.load %arg6[%c2, %c0_67, %c0_68] : memref<8x32x8xf32, #tpu.memory_space<vmem>>, vector<1x32x8xf32>
    %86 = vector.shape_cast %85 : vector<1x32x8xf32> to vector<32x8xf32>
    %cst_69 = arith.constant dense<0.000000e+00> : vector<16x8xf32>
    %87 = tpu.matmul %4, %86, %cst_69 {dimension_numbers = #tpu.dot_dimension_numbers<[1], [0], [0], [1], [0, 0, 1, 1], [], []>} : vector<16x32xf32>, vector<32x8xf32>, vector<16x8xf32> -> vector<16x8xf32>
    %c2_70 = arith.constant 2 : index
    %c0_71 = arith.constant 0 : index
    %c0_72 = arith.constant 0 : index
    %88 = vector.load %arg7[%c2_70, %c0_71, %c0_72] : memref<8x32x8xf32, #tpu.memory_space<vmem>>, vector<1x32x8xf32>
    %89 = vector.shape_cast %88 : vector<1x32x8xf32> to vector<32x8xf32>
    %cst_73 = arith.constant dense<0.000000e+00> : vector<16x8xf32>
    %90 = tpu.matmul %4, %89, %cst_73 {dimension_numbers = #tpu.dot_dimension_numbers<[1], [0], [0], [1], [0, 0, 1, 1], [], []>} : vector<16x32xf32>, vector<32x8xf32>, vector<16x8xf32> -> vector<16x8xf32>
    %c2_74 = arith.constant 2 : index
    %c0_75 = arith.constant 0 : index
    %c0_76 = arith.constant 0 : index
    %91 = vector.load %arg11[%c2_74, %c0_75, %c0_76] : memref<8x8x8xf32, #tpu.memory_space<vmem>>, vector<1x8x8xf32>
    %92 = vector.shape_cast %91 : vector<1x8x8xf32> to vector<8x8xf32>
    %cst_77 = arith.constant dense<0.000000e+00> : vector<8x16xf32>
    %93 = tpu.matmul %92, %87, %cst_77 {dimension_numbers = #tpu.dot_dimension_numbers<[1], [1], [0], [0], [0, 0, 1, 0], [], []>} : vector<8x8xf32>, vector<16x8xf32>, vector<8x16xf32> -> vector<8x16xf32>
    %c2_78 = arith.constant 2 : index
    %c0_79 = arith.constant 0 : index
    %c0_80 = arith.constant 0 : index
    %94 = vector.load %arg12[%c2_78, %c0_79, %c0_80] : memref<8x8x1xf32, #tpu.memory_space<vmem>>, vector<1x8x1xf32>
    %95 = vector.shape_cast %94 : vector<1x8x1xf32> to vector<8x1xf32>
    %cst_81 = arith.constant dense<0xFF800000> : vector<8xf32>
    %96 = vector.multi_reduction <maximumf>, %93, %cst_81 [1] : vector<8x16xf32> to vector<8xf32>
    %97 = vector.shape_cast %96 : vector<8xf32> to vector<8x1xf32>
    %98 = arith.maximumf %95, %97 : vector<8x1xf32>
    %99 = arith.subf %95, %98 : vector<8x1xf32>
    %100 = math.exp %99 : vector<8x1xf32>
    %101 = vector.broadcast %98 : vector<8x1xf32> to vector<8x16xf32>
    %102 = arith.subf %93, %101 : vector<8x16xf32>
    %103 = math.exp %102 : vector<8x16xf32>
    %c2_82 = arith.constant 2 : index
    %c0_83 = arith.constant 0 : index
    %c0_84 = arith.constant 0 : index
    %104 = vector.load %arg13[%c2_82, %c0_83, %c0_84] : memref<8x8x1xf32, #tpu.memory_space<vmem>>, vector<1x8x1xf32>
    %105 = vector.shape_cast %104 : vector<1x8x1xf32> to vector<8x1xf32>
    %106 = arith.mulf %100, %105 : vector<8x1xf32>
    %cst_85 = arith.constant dense<0.000000e+00> : vector<8xf32>
    %107 = vector.multi_reduction <add>, %103, %cst_85 [1] : vector<8x16xf32> to vector<8xf32>
    %108 = vector.shape_cast %107 : vector<8xf32> to vector<8x1xf32>
    %109 = arith.addf %106, %108 : vector<8x1xf32>
    %c2_86 = arith.constant 2 : index
    %c0_87 = arith.constant 0 : index
    %c0_88 = arith.constant 0 : index
    %110 = vector.load %arg13[%c2_86, %c0_87, %c0_88] : memref<8x8x1xf32, #tpu.memory_space<vmem>>, vector<1x8x1xf32>
    %111 = vector.shape_cast %110 : vector<1x8x1xf32> to vector<8x1xf32>
    %112 = vector.shape_cast %109 : vector<8x1xf32> to vector<1x8x1xf32>
    tpu.vector_store %arg13[%c2_86, %c0_87, %c0_88], %112 {strides = array<i32>} : memref<8x8x1xf32, #tpu.memory_space<vmem>>, vector<1x8x1xf32>,
    %c2_89 = arith.constant 2 : index
    %c0_90 = arith.constant 0 : index
    %c0_91 = arith.constant 0 : index
    %113 = vector.load %arg14[%c2_89, %c0_90, %c0_91] : memref<8x8x8xf32, #tpu.memory_space<vmem>>, vector<1x8x8xf32>
    %114 = vector.shape_cast %113 : vector<1x8x8xf32> to vector<8x8xf32>
    %115 = vector.broadcast %100 : vector<8x1xf32> to vector<8x8xf32>
    %116 = arith.mulf %115, %114 : vector<8x8xf32>
    %cst_92 = arith.constant dense<0.000000e+00> : vector<8x8xf32>
    %117 = tpu.matmul %103, %90, %cst_92 {dimension_numbers = #tpu.dot_dimension_numbers<[1], [0], [0], [1], [0, 0, 1, 1], [], []>} : vector<8x16xf32>, vector<16x8xf32>, vector<8x8xf32> -> vector<8x8xf32>
    %118 = arith.addf %116, %117 : vector<8x8xf32>
    %c2_93 = arith.constant 2 : index
    %c0_94 = arith.constant 0 : index
    %c0_95 = arith.constant 0 : index
    %119 = vector.load %arg14[%c2_93, %c0_94, %c0_95] : memref<8x8x8xf32, #tpu.memory_space<vmem>>, vector<1x8x8xf32>
    %120 = vector.shape_cast %119 : vector<1x8x8xf32> to vector<8x8xf32>
    %121 = vector.shape_cast %118 : vector<8x8xf32> to vector<1x8x8xf32>
    tpu.vector_store %arg14[%c2_93, %c0_94, %c0_95], %121 {strides = array<i32>} : memref<8x8x8xf32, #tpu.memory_space<vmem>>, vector<1x8x8xf32>,
    %c2_96 = arith.constant 2 : index
    %c0_97 = arith.constant 0 : index
    %c0_98 = arith.constant 0 : index
    %122 = vector.load %arg12[%c2_96, %c0_97, %c0_98] : memref<8x8x1xf32, #tpu.memory_space<vmem>>, vector<1x8x1xf32>
    %123 = vector.shape_cast %122 : vector<1x8x1xf32> to vector<8x1xf32>
    %124 = vector.shape_cast %98 : vector<8x1xf32> to vector<1x8x1xf32>
    tpu.vector_store %arg12[%c2_96, %c0_97, %c0_98], %124 {strides = array<i32>} : memref<8x8x1xf32, #tpu.memory_space<vmem>>, vector<1x8x1xf32>,
    %c3 = arith.constant 3 : index
    %c0_99 = arith.constant 0 : index
    %c0_100 = arith.constant 0 : index
    %125 = vector.load %arg6[%c3, %c0_99, %c0_100] : memref<8x32x8xf32, #tpu.memory_space<vmem>>, vector<1x32x8xf32>
    %126 = vector.shape_cast %125 : vector<1x32x8xf32> to vector<32x8xf32>
    %cst_101 = arith.constant dense<0.000000e+00> : vector<16x8xf32>
    %127 = tpu.matmul %4, %126, %cst_101 {dimension_numbers = #tpu.dot_dimension_numbers<[1], [0], [0], [1], [0, 0, 1, 1], [], []>} : vector<16x32xf32>, vector<32x8xf32>, vector<16x8xf32> -> vector<16x8xf32>
    %c3_102 = arith.constant 3 : index
    %c0_103 = arith.constant 0 : index
    %c0_104 = arith.constant 0 : index
    %128 = vector.load %arg7[%c3_102, %c0_103, %c0_104] : memref<8x32x8xf32, #tpu.memory_space<vmem>>, vector<1x32x8xf32>
    %129 = vector.shape_cast %128 : vector<1x32x8xf32> to vector<32x8xf32>
    %cst_105 = arith.constant dense<0.000000e+00> : vector<16x8xf32>
    %130 = tpu.matmul %4, %129, %cst_105 {dimension_numbers = #tpu.dot_dimension_numbers<[1], [0], [0], [1], [0, 0, 1, 1], [], []>} : vector<16x32xf32>, vector<32x8xf32>, vector<16x8xf32> -> vector<16x8xf32>
    %c3_106 = arith.constant 3 : index
    %c0_107 = arith.constant 0 : index
    %c0_108 = arith.constant 0 : index
    %131 = vector.load %arg11[%c3_106, %c0_107, %c0_108] : memref<8x8x8xf32, #tpu.memory_space<vmem>>, vector<1x8x8xf32>
    %132 = vector.shape_cast %131 : vector<1x8x8xf32> to vector<8x8xf32>
    %cst_109 = arith.constant dense<0.000000e+00> : vector<8x16xf32>
    %133 = tpu.matmul %132, %127, %cst_109 {dimension_numbers = #tpu.dot_dimension_numbers<[1], [1], [0], [0], [0, 0, 1, 0], [], []>} : vector<8x8xf32>, vector<16x8xf32>, vector<8x16xf32> -> vector<8x16xf32>
    %c3_110 = arith.constant 3 : index
    %c0_111 = arith.constant 0 : index
    %c0_112 = arith.constant 0 : index
    %134 = vector.load %arg12[%c3_110, %c0_111, %c0_112] : memref<8x8x1xf32, #tpu.memory_space<vmem>>, vector<1x8x1xf32>
    %135 = vector.shape_cast %134 : vector<1x8x1xf32> to vector<8x1xf32>
    %cst_113 = arith.constant dense<0xFF800000> : vector<8xf32>
    %136 = vector.multi_reduction <maximumf>, %133, %cst_113 [1] : vector<8x16xf32> to vector<8xf32>
    %137 = vector.shape_cast %136 : vector<8xf32> to vector<8x1xf32>
    %138 = arith.maximumf %135, %137 : vector<8x1xf32>
    %139 = arith.subf %135, %138 : vector<8x1xf32>
    %140 = math.exp %139 : vector<8x1xf32>
    %141 = vector.broadcast %138 : vector<8x1xf32> to vector<8x16xf32>
    %142 = arith.subf %133, %141 : vector<8x16xf32>
    %143 = math.exp %142 : vector<8x16xf32>
    %c3_114 = arith.constant 3 : index
    %c0_115 = arith.constant 0 : index
    %c0_116 = arith.constant 0 : index
    %144 = vector.load %arg13[%c3_114, %c0_115, %c0_116] : memref<8x8x1xf32, #tpu.memory_space<vmem>>, vector<1x8x1xf32>
    %145 = vector.shape_cast %144 : vector<1x8x1xf32> to vector<8x1xf32>
    %146 = arith.mulf %140, %145 : vector<8x1xf32>
    %cst_117 = arith.constant dense<0.000000e+00> : vector<8xf32>
    %147 = vector.multi_reduction <add>, %143, %cst_117 [1] : vector<8x16xf32> to vector<8xf32>
    %148 = vector.shape_cast %147 : vector<8xf32> to vector<8x1xf32>
    %149 = arith.addf %146, %148 : vector<8x1xf32>
    %c3_118 = arith.constant 3 : index
    %c0_119 = arith.constant 0 : index
    %c0_120 = arith.constant 0 : index
    %150 = vector.load %arg13[%c3_118, %c0_119, %c0_120] : memref<8x8x1xf32, #tpu.memory_space<vmem>>, vector<1x8x1xf32>
    %151 = vector.shape_cast %150 : vector<1x8x1xf32> to vector<8x1xf32>
    %152 = vector.shape_cast %149 : vector<8x1xf32> to vector<1x8x1xf32>
    tpu.vector_store %arg13[%c3_118, %c0_119, %c0_120], %152 {strides = array<i32>} : memref<8x8x1xf32, #tpu.memory_space<vmem>>, vector<1x8x1xf32>,
    %c3_121 = arith.constant 3 : index
    %c0_122 = arith.constant 0 : index
    %c0_123 = arith.constant 0 : index
    %153 = vector.load %arg14[%c3_121, %c0_122, %c0_123] : memref<8x8x8xf32, #tpu.memory_space<vmem>>, vector<1x8x8xf32>
    %154 = vector.shape_cast %153 : vector<1x8x8xf32> to vector<8x8xf32>
    %155 = vector.broadcast %140 : vector<8x1xf32> to vector<8x8xf32>
    %156 = arith.mulf %155, %154 : vector<8x8xf32>
    %cst_124 = arith.constant dense<0.000000e+00> : vector<8x8xf32>
    %157 = tpu.matmul %143, %130, %cst_124 {dimension_numbers = #tpu.dot_dimension_numbers<[1], [0], [0], [1], [0, 0, 1, 1], [], []>} : vector<8x16xf32>, vector<16x8xf32>, vector<8x8xf32> -> vector<8x8xf32>
    %158 = arith.addf %156, %157 : vector<8x8xf32>
    %c3_125 = arith.constant 3 : index
    %c0_126 = arith.constant 0 : index
    %c0_127 = arith.constant 0 : index
    %159 = vector.load %arg14[%c3_125, %c0_126, %c0_127] : memref<8x8x8xf32, #tpu.memory_space<vmem>>, vector<1x8x8xf32>
    %160 = vector.shape_cast %159 : vector<1x8x8xf32> to vector<8x8xf32>
    %161 = vector.shape_cast %158 : vector<8x8xf32> to vector<1x8x8xf32>
    tpu.vector_store %arg14[%c3_125, %c0_126, %c0_127], %161 {strides = array<i32>} : memref<8x8x8xf32, #tpu.memory_space<vmem>>, vector<1x8x8xf32>,
    %c3_128 = arith.constant 3 : index
    %c0_129 = arith.constant 0 : index
    %c0_130 = arith.constant 0 : index
    %162 = vector.load %arg12[%c3_128, %c0_129, %c0_130] : memref<8x8x1xf32, #tpu.memory_space<vmem>>, vector<1x8x1xf32>
    %163 = vector.shape_cast %162 : vector<1x8x1xf32> to vector<8x1xf32>
    %164 = vector.shape_cast %138 : vector<8x1xf32> to vector<1x8x1xf32>
    tpu.vector_store %arg12[%c3_128, %c0_129, %c0_130], %164 {strides = array<i32>} : memref<8x8x1xf32, #tpu.memory_space<vmem>>, vector<1x8x1xf32>,
    %c4 = arith.constant 4 : index
    %c0_131 = arith.constant 0 : index
    %c0_132 = arith.constant 0 : index
    %165 = vector.load %arg6[%c4, %c0_131, %c0_132] : memref<8x32x8xf32, #tpu.memory_space<vmem>>, vector<1x32x8xf32>
    %166 = vector.shape_cast %165 : vector<1x32x8xf32> to vector<32x8xf32>
    %cst_133 = arith.constant dense<0.000000e+00> : vector<16x8xf32>
    %167 = tpu.matmul %4, %166, %cst_133 {dimension_numbers = #tpu.dot_dimension_numbers<[1], [0], [0], [1], [0, 0, 1, 1], [], []>} : vector<16x32xf32>, vector<32x8xf32>, vector<16x8xf32> -> vector<16x8xf32>
    %c4_134 = arith.constant 4 : index
    %c0_135 = arith.constant 0 : index
    %c0_136 = arith.constant 0 : index
    %168 = vector.load %arg7[%c4_134, %c0_135, %c0_136] : memref<8x32x8xf32, #tpu.memory_space<vmem>>, vector<1x32x8xf32>
    %169 = vector.shape_cast %168 : vector<1x32x8xf32> to vector<32x8xf32>
    %cst_137 = arith.constant dense<0.000000e+00> : vector<16x8xf32>
    %170 = tpu.matmul %4, %169, %cst_137 {dimension_numbers = #tpu.dot_dimension_numbers<[1], [0], [0], [1], [0, 0, 1, 1], [], []>} : vector<16x32xf32>, vector<32x8xf32>, vector<16x8xf32> -> vector<16x8xf32>
    %c4_138 = arith.constant 4 : index
    %c0_139 = arith.constant 0 : index
    %c0_140 = arith.constant 0 : index
    %171 = vector.load %arg11[%c4_138, %c0_139, %c0_140] : memref<8x8x8xf32, #tpu.memory_space<vmem>>, vector<1x8x8xf32>
    %172 = vector.shape_cast %171 : vector<1x8x8xf32> to vector<8x8xf32>
    %cst_141 = arith.constant dense<0.000000e+00> : vector<8x16xf32>
    %173 = tpu.matmul %172, %167, %cst_141 {dimension_numbers = #tpu.dot_dimension_numbers<[1], [1], [0], [0], [0, 0, 1, 0], [], []>} : vector<8x8xf32>, vector<16x8xf32>, vector<8x16xf32> -> vector<8x16xf32>
    %c4_142 = arith.constant 4 : index
    %c0_143 = arith.constant 0 : index
    %c0_144 = arith.constant 0 : index
    %174 = vector.load %arg12[%c4_142, %c0_143, %c0_144] : memref<8x8x1xf32, #tpu.memory_space<vmem>>, vector<1x8x1xf32>
    %175 = vector.shape_cast %174 : vector<1x8x1xf32> to vector<8x1xf32>
    %cst_145 = arith.constant dense<0xFF800000> : vector<8xf32>
    %176 = vector.multi_reduction <maximumf>, %173, %cst_145 [1] : vector<8x16xf32> to vector<8xf32>
    %177 = vector.shape_cast %176 : vector<8xf32> to vector<8x1xf32>
    %178 = arith.maximumf %175, %177 : vector<8x1xf32>
    %179 = arith.subf %175, %178 : vector<8x1xf32>
    %180 = math.exp %179 : vector<8x1xf32>
    %181 = vector.broadcast %178 : vector<8x1xf32> to vector<8x16xf32>
    %182 = arith.subf %173, %181 : vector<8x16xf32>
    %183 = math.exp %182 : vector<8x16xf32>
    %c4_146 = arith.constant 4 : index
    %c0_147 = arith.constant 0 : index
    %c0_148 = arith.constant 0 : index
    %184 = vector.load %arg13[%c4_146, %c0_147, %c0_148] : memref<8x8x1xf32, #tpu.memory_space<vmem>>, vector<1x8x1xf32>
    %185 = vector.shape_cast %184 : vector<1x8x1xf32> to vector<8x1xf32>
    %186 = arith.mulf %180, %185 : vector<8x1xf32>
    %cst_149 = arith.constant dense<0.000000e+00> : vector<8xf32>
    %187 = vector.multi_reduction <add>, %183, %cst_149 [1] : vector<8x16xf32> to vector<8xf32>
    %188 = vector.shape_cast %187 : vector<8xf32> to vector<8x1xf32>
    %189 = arith.addf %186, %188 : vector<8x1xf32>
    %c4_150 = arith.constant 4 : index
    %c0_151 = arith.constant 0 : index
    %c0_152 = arith.constant 0 : index
    %190 = vector.load %arg13[%c4_150, %c0_151, %c0_152] : memref<8x8x1xf32, #tpu.memory_space<vmem>>, vector<1x8x1xf32>
    %191 = vector.shape_cast %190 : vector<1x8x1xf32> to vector<8x1xf32>
    %192 = vector.shape_cast %189 : vector<8x1xf32> to vector<1x8x1xf32>
    tpu.vector_store %arg13[%c4_150, %c0_151, %c0_152], %192 {strides = array<i32>} : memref<8x8x1xf32, #tpu.memory_space<vmem>>, vector<1x8x1xf32>,
    %c4_153 = arith.constant 4 : index
    %c0_154 = arith.constant 0 : index
    %c0_155 = arith.constant 0 : index
    %193 = vector.load %arg14[%c4_153, %c0_154, %c0_155] : memref<8x8x8xf32, #tpu.memory_space<vmem>>, vector<1x8x8xf32>
    %194 = vector.shape_cast %193 : vector<1x8x8xf32> to vector<8x8xf32>
    %195 = vector.broadcast %180 : vector<8x1xf32> to vector<8x8xf32>
    %196 = arith.mulf %195, %194 : vector<8x8xf32>
    %cst_156 = arith.constant dense<0.000000e+00> : vector<8x8xf32>
    %197 = tpu.matmul %183, %170, %cst_156 {dimension_numbers = #tpu.dot_dimension_numbers<[1], [0], [0], [1], [0, 0, 1, 1], [], []>} : vector<8x16xf32>, vector<16x8xf32>, vector<8x8xf32> -> vector<8x8xf32>
    %198 = arith.addf %196, %197 : vector<8x8xf32>
    %c4_157 = arith.constant 4 : index
    %c0_158 = arith.constant 0 : index
    %c0_159 = arith.constant 0 : index
    %199 = vector.load %arg14[%c4_157, %c0_158, %c0_159] : memref<8x8x8xf32, #tpu.memory_space<vmem>>, vector<1x8x8xf32>
    %200 = vector.shape_cast %199 : vector<1x8x8xf32> to vector<8x8xf32>
    %201 = vector.shape_cast %198 : vector<8x8xf32> to vector<1x8x8xf32>
    tpu.vector_store %arg14[%c4_157, %c0_158, %c0_159], %201 {strides = array<i32>} : memref<8x8x8xf32, #tpu.memory_space<vmem>>, vector<1x8x8xf32>,
    %c4_160 = arith.constant 4 : index
    %c0_161 = arith.constant 0 : index
    %c0_162 = arith.constant 0 : index
    %202 = vector.load %arg12[%c4_160, %c0_161, %c0_162] : memref<8x8x1xf32, #tpu.memory_space<vmem>>, vector<1x8x1xf32>
    %203 = vector.shape_cast %202 : vector<1x8x1xf32> to vector<8x1xf32>
    %204 = vector.shape_cast %178 : vector<8x1xf32> to vector<1x8x1xf32>
    tpu.vector_store %arg12[%c4_160, %c0_161, %c0_162], %204 {strides = array<i32>} : memref<8x8x1xf32, #tpu.memory_space<vmem>>, vector<1x8x1xf32>,
    %c5 = arith.constant 5 : index
    %c0_163 = arith.constant 0 : index
    %c0_164 = arith.constant 0 : index
    %205 = vector.load %arg6[%c5, %c0_163, %c0_164] : memref<8x32x8xf32, #tpu.memory_space<vmem>>, vector<1x32x8xf32>
    %206 = vector.shape_cast %205 : vector<1x32x8xf32> to vector<32x8xf32>
    %cst_165 = arith.constant dense<0.000000e+00> : vector<16x8xf32>
    %207 = tpu.matmul %4, %206, %cst_165 {dimension_numbers = #tpu.dot_dimension_numbers<[1], [0], [0], [1], [0, 0, 1, 1], [], []>} : vector<16x32xf32>, vector<32x8xf32>, vector<16x8xf32> -> vector<16x8xf32>
    %c5_166 = arith.constant 5 : index
    %c0_167 = arith.constant 0 : index
    %c0_168 = arith.constant 0 : index
    %208 = vector.load %arg7[%c5_166, %c0_167, %c0_168] : memref<8x32x8xf32, #tpu.memory_space<vmem>>, vector<1x32x8xf32>
    %209 = vector.shape_cast %208 : vector<1x32x8xf32> to vector<32x8xf32>
    %cst_169 = arith.constant dense<0.000000e+00> : vector<16x8xf32>
    %210 = tpu.matmul %4, %209, %cst_169 {dimension_numbers = #tpu.dot_dimension_numbers<[1], [0], [0], [1], [0, 0, 1, 1], [], []>} : vector<16x32xf32>, vector<32x8xf32>, vector<16x8xf32> -> vector<16x8xf32>
    %c5_170 = arith.constant 5 : index
    %c0_171 = arith.constant 0 : index
    %c0_172 = arith.constant 0 : index
    %211 = vector.load %arg11[%c5_170, %c0_171, %c0_172] : memref<8x8x8xf32, #tpu.memory_space<vmem>>, vector<1x8x8xf32>
    %212 = vector.shape_cast %211 : vector<1x8x8xf32> to vector<8x8xf32>
    %cst_173 = arith.constant dense<0.000000e+00> : vector<8x16xf32>
    %213 = tpu.matmul %212, %207, %cst_173 {dimension_numbers = #tpu.dot_dimension_numbers<[1], [1], [0], [0], [0, 0, 1, 0], [], []>} : vector<8x8xf32>, vector<16x8xf32>, vector<8x16xf32> -> vector<8x16xf32>
    %c5_174 = arith.constant 5 : index
    %c0_175 = arith.constant 0 : index
    %c0_176 = arith.constant 0 : index
    %214 = vector.load %arg12[%c5_174, %c0_175, %c0_176] : memref<8x8x1xf32, #tpu.memory_space<vmem>>, vector<1x8x1xf32>
    %215 = vector.shape_cast %214 : vector<1x8x1xf32> to vector<8x1xf32>
    %cst_177 = arith.constant dense<0xFF800000> : vector<8xf32>
    %216 = vector.multi_reduction <maximumf>, %213, %cst_177 [1] : vector<8x16xf32> to vector<8xf32>
    %217 = vector.shape_cast %216 : vector<8xf32> to vector<8x1xf32>
    %218 = arith.maximumf %215, %217 : vector<8x1xf32>
    %219 = arith.subf %215, %218 : vector<8x1xf32>
    %220 = math.exp %219 : vector<8x1xf32>
    %221 = vector.broadcast %218 : vector<8x1xf32> to vector<8x16xf32>
    %222 = arith.subf %213, %221 : vector<8x16xf32>
    %223 = math.exp %222 : vector<8x16xf32>
    %c5_178 = arith.constant 5 : index
    %c0_179 = arith.constant 0 : index
    %c0_180 = arith.constant 0 : index
    %224 = vector.load %arg13[%c5_178, %c0_179, %c0_180] : memref<8x8x1xf32, #tpu.memory_space<vmem>>, vector<1x8x1xf32>
    %225 = vector.shape_cast %224 : vector<1x8x1xf32> to vector<8x1xf32>
    %226 = arith.mulf %220, %225 : vector<8x1xf32>
    %cst_181 = arith.constant dense<0.000000e+00> : vector<8xf32>
    %227 = vector.multi_reduction <add>, %223, %cst_181 [1] : vector<8x16xf32> to vector<8xf32>
    %228 = vector.shape_cast %227 : vector<8xf32> to vector<8x1xf32>
    %229 = arith.addf %226, %228 : vector<8x1xf32>
    %c5_182 = arith.constant 5 : index
    %c0_183 = arith.constant 0 : index
    %c0_184 = arith.constant 0 : index
    %230 = vector.load %arg13[%c5_182, %c0_183, %c0_184] : memref<8x8x1xf32, #tpu.memory_space<vmem>>, vector<1x8x1xf32>
    %231 = vector.shape_cast %230 : vector<1x8x1xf32> to vector<8x1xf32>
    %232 = vector.shape_cast %229 : vector<8x1xf32> to vector<1x8x1xf32>
    tpu.vector_store %arg13[%c5_182, %c0_183, %c0_184], %232 {strides = array<i32>} : memref<8x8x1xf32, #tpu.memory_space<vmem>>, vector<1x8x1xf32>,
    %c5_185 = arith.constant 5 : index
    %c0_186 = arith.constant 0 : index
    %c0_187 = arith.constant 0 : index
    %233 = vector.load %arg14[%c5_185, %c0_186, %c0_187] : memref<8x8x8xf32, #tpu.memory_space<vmem>>, vector<1x8x8xf32>
    %234 = vector.shape_cast %233 : vector<1x8x8xf32> to vector<8x8xf32>
    %235 = vector.broadcast %220 : vector<8x1xf32> to vector<8x8xf32>
    %236 = arith.mulf %235, %234 : vector<8x8xf32>
    %cst_188 = arith.constant dense<0.000000e+00> : vector<8x8xf32>
    %237 = tpu.matmul %223, %210, %cst_188 {dimension_numbers = #tpu.dot_dimension_numbers<[1], [0], [0], [1], [0, 0, 1, 1], [], []>} : vector<8x16xf32>, vector<16x8xf32>, vector<8x8xf32> -> vector<8x8xf32>
    %238 = arith.addf %236, %237 : vector<8x8xf32>
    %c5_189 = arith.constant 5 : index
    %c0_190 = arith.constant 0 : index
    %c0_191 = arith.constant 0 : index
    %239 = vector.load %arg14[%c5_189, %c0_190, %c0_191] : memref<8x8x8xf32, #tpu.memory_space<vmem>>, vector<1x8x8xf32>
    %240 = vector.shape_cast %239 : vector<1x8x8xf32> to vector<8x8xf32>
    %241 = vector.shape_cast %238 : vector<8x8xf32> to vector<1x8x8xf32>
    tpu.vector_store %arg14[%c5_189, %c0_190, %c0_191], %241 {strides = array<i32>} : memref<8x8x8xf32, #tpu.memory_space<vmem>>, vector<1x8x8xf32>,
    %c5_192 = arith.constant 5 : index
    %c0_193 = arith.constant 0 : index
    %c0_194 = arith.constant 0 : index
    %242 = vector.load %arg12[%c5_192, %c0_193, %c0_194] : memref<8x8x1xf32, #tpu.memory_space<vmem>>, vector<1x8x1xf32>
    %243 = vector.shape_cast %242 : vector<1x8x1xf32> to vector<8x1xf32>
    %244 = vector.shape_cast %218 : vector<8x1xf32> to vector<1x8x1xf32>
    tpu.vector_store %arg12[%c5_192, %c0_193, %c0_194], %244 {strides = array<i32>} : memref<8x8x1xf32, #tpu.memory_space<vmem>>, vector<1x8x1xf32>,
    %c6 = arith.constant 6 : index
    %c0_195 = arith.constant 0 : index
    %c0_196 = arith.constant 0 : index
    %245 = vector.load %arg6[%c6, %c0_195, %c0_196] : memref<8x32x8xf32, #tpu.memory_space<vmem>>, vector<1x32x8xf32>
    %246 = vector.shape_cast %245 : vector<1x32x8xf32> to vector<32x8xf32>
    %cst_197 = arith.constant dense<0.000000e+00> : vector<16x8xf32>
    %247 = tpu.matmul %4, %246, %cst_197 {dimension_numbers = #tpu.dot_dimension_numbers<[1], [0], [0], [1], [0, 0, 1, 1], [], []>} : vector<16x32xf32>, vector<32x8xf32>, vector<16x8xf32> -> vector<16x8xf32>
    %c6_198 = arith.constant 6 : index
    %c0_199 = arith.constant 0 : index
    %c0_200 = arith.constant 0 : index
    %248 = vector.load %arg7[%c6_198, %c0_199, %c0_200] : memref<8x32x8xf32, #tpu.memory_space<vmem>>, vector<1x32x8xf32>
    %249 = vector.shape_cast %248 : vector<1x32x8xf32> to vector<32x8xf32>
    %cst_201 = arith.constant dense<0.000000e+00> : vector<16x8xf32>
    %250 = tpu.matmul %4, %249, %cst_201 {dimension_numbers = #tpu.dot_dimension_numbers<[1], [0], [0], [1], [0, 0, 1, 1], [], []>} : vector<16x32xf32>, vector<32x8xf32>, vector<16x8xf32> -> vector<16x8xf32>
    %c6_202 = arith.constant 6 : index
    %c0_203 = arith.constant 0 : index
    %c0_204 = arith.constant 0 : index
    %251 = vector.load %arg11[%c6_202, %c0_203, %c0_204] : memref<8x8x8xf32, #tpu.memory_space<vmem>>, vector<1x8x8xf32>
    %252 = vector.shape_cast %251 : vector<1x8x8xf32> to vector<8x8xf32>
    %cst_205 = arith.constant dense<0.000000e+00> : vector<8x16xf32>
    %253 = tpu.matmul %252, %247, %cst_205 {dimension_numbers = #tpu.dot_dimension_numbers<[1], [1], [0], [0], [0, 0, 1, 0], [], []>} : vector<8x8xf32>, vector<16x8xf32>, vector<8x16xf32> -> vector<8x16xf32>
    %c6_206 = arith.constant 6 : index
    %c0_207 = arith.constant 0 : index
    %c0_208 = arith.constant 0 : index
    %254 = vector.load %arg12[%c6_206, %c0_207, %c0_208] : memref<8x8x1xf32, #tpu.memory_space<vmem>>, vector<1x8x1xf32>
    %255 = vector.shape_cast %254 : vector<1x8x1xf32> to vector<8x1xf32>
    %cst_209 = arith.constant dense<0xFF800000> : vector<8xf32>
    %256 = vector.multi_reduction <maximumf>, %253, %cst_209 [1] : vector<8x16xf32> to vector<8xf32>
    %257 = vector.shape_cast %256 : vector<8xf32> to vector<8x1xf32>
    %258 = arith.maximumf %255, %257 : vector<8x1xf32>
    %259 = arith.subf %255, %258 : vector<8x1xf32>
    %260 = math.exp %259 : vector<8x1xf32>
    %261 = vector.broadcast %258 : vector<8x1xf32> to vector<8x16xf32>
    %262 = arith.subf %253, %261 : vector<8x16xf32>
    %263 = math.exp %262 : vector<8x16xf32>
    %c6_210 = arith.constant 6 : index
    %c0_211 = arith.constant 0 : index
    %c0_212 = arith.constant 0 : index
    %264 = vector.load %arg13[%c6_210, %c0_211, %c0_212] : memref<8x8x1xf32, #tpu.memory_space<vmem>>, vector<1x8x1xf32>
    %265 = vector.shape_cast %264 : vector<1x8x1xf32> to vector<8x1xf32>
    %266 = arith.mulf %260, %265 : vector<8x1xf32>
    %cst_213 = arith.constant dense<0.000000e+00> : vector<8xf32>
    %267 = vector.multi_reduction <add>, %263, %cst_213 [1] : vector<8x16xf32> to vector<8xf32>
    %268 = vector.shape_cast %267 : vector<8xf32> to vector<8x1xf32>
    %269 = arith.addf %266, %268 : vector<8x1xf32>
    %c6_214 = arith.constant 6 : index
    %c0_215 = arith.constant 0 : index
    %c0_216 = arith.constant 0 : index
    %270 = vector.load %arg13[%c6_214, %c0_215, %c0_216] : memref<8x8x1xf32, #tpu.memory_space<vmem>>, vector<1x8x1xf32>
    %271 = vector.shape_cast %270 : vector<1x8x1xf32> to vector<8x1xf32>
    %272 = vector.shape_cast %269 : vector<8x1xf32> to vector<1x8x1xf32>
    tpu.vector_store %arg13[%c6_214, %c0_215, %c0_216], %272 {strides = array<i32>} : memref<8x8x1xf32, #tpu.memory_space<vmem>>, vector<1x8x1xf32>,
    %c6_217 = arith.constant 6 : index
    %c0_218 = arith.constant 0 : index
    %c0_219 = arith.constant 0 : index
    %273 = vector.load %arg14[%c6_217, %c0_218, %c0_219] : memref<8x8x8xf32, #tpu.memory_space<vmem>>, vector<1x8x8xf32>
    %274 = vector.shape_cast %273 : vector<1x8x8xf32> to vector<8x8xf32>
    %275 = vector.broadcast %260 : vector<8x1xf32> to vector<8x8xf32>
    %276 = arith.mulf %275, %274 : vector<8x8xf32>
    %cst_220 = arith.constant dense<0.000000e+00> : vector<8x8xf32>
    %277 = tpu.matmul %263, %250, %cst_220 {dimension_numbers = #tpu.dot_dimension_numbers<[1], [0], [0], [1], [0, 0, 1, 1], [], []>} : vector<8x16xf32>, vector<16x8xf32>, vector<8x8xf32> -> vector<8x8xf32>
    %278 = arith.addf %276, %277 : vector<8x8xf32>
    %c6_221 = arith.constant 6 : index
    %c0_222 = arith.constant 0 : index
    %c0_223 = arith.constant 0 : index
    %279 = vector.load %arg14[%c6_221, %c0_222, %c0_223] : memref<8x8x8xf32, #tpu.memory_space<vmem>>, vector<1x8x8xf32>
    %280 = vector.shape_cast %279 : vector<1x8x8xf32> to vector<8x8xf32>
    %281 = vector.shape_cast %278 : vector<8x8xf32> to vector<1x8x8xf32>
    tpu.vector_store %arg14[%c6_221, %c0_222, %c0_223], %281 {strides = array<i32>} : memref<8x8x8xf32, #tpu.memory_space<vmem>>, vector<1x8x8xf32>,
    %c6_224 = arith.constant 6 : index
    %c0_225 = arith.constant 0 : index
    %c0_226 = arith.constant 0 : index
    %282 = vector.load %arg12[%c6_224, %c0_225, %c0_226] : memref<8x8x1xf32, #tpu.memory_space<vmem>>, vector<1x8x1xf32>
    %283 = vector.shape_cast %282 : vector<1x8x1xf32> to vector<8x1xf32>
    %284 = vector.shape_cast %258 : vector<8x1xf32> to vector<1x8x1xf32>
    tpu.vector_store %arg12[%c6_224, %c0_225, %c0_226], %284 {strides = array<i32>} : memref<8x8x1xf32, #tpu.memory_space<vmem>>, vector<1x8x1xf32>,
    %c7 = arith.constant 7 : index
    %c0_227 = arith.constant 0 : index
    %c0_228 = arith.constant 0 : index
    %285 = vector.load %arg6[%c7, %c0_227, %c0_228] : memref<8x32x8xf32, #tpu.memory_space<vmem>>, vector<1x32x8xf32>
    %286 = vector.shape_cast %285 : vector<1x32x8xf32> to vector<32x8xf32>
    %cst_229 = arith.constant dense<0.000000e+00> : vector<16x8xf32>
    %287 = tpu.matmul %4, %286, %cst_229 {dimension_numbers = #tpu.dot_dimension_numbers<[1], [0], [0], [1], [0, 0, 1, 1], [], []>} : vector<16x32xf32>, vector<32x8xf32>, vector<16x8xf32> -> vector<16x8xf32>
    %c7_230 = arith.constant 7 : index
    %c0_231 = arith.constant 0 : index
    %c0_232 = arith.constant 0 : index
    %288 = vector.load %arg7[%c7_230, %c0_231, %c0_232] : memref<8x32x8xf32, #tpu.memory_space<vmem>>, vector<1x32x8xf32>
    %289 = vector.shape_cast %288 : vector<1x32x8xf32> to vector<32x8xf32>
    %cst_233 = arith.constant dense<0.000000e+00> : vector<16x8xf32>
    %290 = tpu.matmul %4, %289, %cst_233 {dimension_numbers = #tpu.dot_dimension_numbers<[1], [0], [0], [1], [0, 0, 1, 1], [], []>} : vector<16x32xf32>, vector<32x8xf32>, vector<16x8xf32> -> vector<16x8xf32>
    %c7_234 = arith.constant 7 : index
    %c0_235 = arith.constant 0 : index
    %c0_236 = arith.constant 0 : index
    %291 = vector.load %arg11[%c7_234, %c0_235, %c0_236] : memref<8x8x8xf32, #tpu.memory_space<vmem>>, vector<1x8x8xf32>
    %292 = vector.shape_cast %291 : vector<1x8x8xf32> to vector<8x8xf32>
    %cst_237 = arith.constant dense<0.000000e+00> : vector<8x16xf32>
    %293 = tpu.matmul %292, %287, %cst_237 {dimension_numbers = #tpu.dot_dimension_numbers<[1], [1], [0], [0], [0, 0, 1, 0], [], []>} : vector<8x8xf32>, vector<16x8xf32>, vector<8x16xf32> -> vector<8x16xf32>
    %c7_238 = arith.constant 7 : index
    %c0_239 = arith.constant 0 : index
    %c0_240 = arith.constant 0 : index
    %294 = vector.load %arg12[%c7_238, %c0_239, %c0_240] : memref<8x8x1xf32, #tpu.memory_space<vmem>>, vector<1x8x1xf32>
    %295 = vector.shape_cast %294 : vector<1x8x1xf32> to vector<8x1xf32>
    %cst_241 = arith.constant dense<0xFF800000> : vector<8xf32>
    %296 = vector.multi_reduction <maximumf>, %293, %cst_241 [1] : vector<8x16xf32> to vector<8xf32>
    %297 = vector.shape_cast %296 : vector<8xf32> to vector<8x1xf32>
    %298 = arith.maximumf %295, %297 : vector<8x1xf32>
    %299 = arith.subf %295, %298 : vector<8x1xf32>
    %300 = math.exp %299 : vector<8x1xf32>
    %301 = vector.broadcast %298 : vector<8x1xf32> to vector<8x16xf32>
    %302 = arith.subf %293, %301 : vector<8x16xf32>
    %303 = math.exp %302 : vector<8x16xf32>
    %c7_242 = arith.constant 7 : index
    %c0_243 = arith.constant 0 : index
    %c0_244 = arith.constant 0 : index
    %304 = vector.load %arg13[%c7_242, %c0_243, %c0_244] : memref<8x8x1xf32, #tpu.memory_space<vmem>>, vector<1x8x1xf32>
    %305 = vector.shape_cast %304 : vector<1x8x1xf32> to vector<8x1xf32>
    %306 = arith.mulf %300, %305 : vector<8x1xf32>
    %cst_245 = arith.constant dense<0.000000e+00> : vector<8xf32>
    %307 = vector.multi_reduction <add>, %303, %cst_245 [1] : vector<8x16xf32> to vector<8xf32>
    %308 = vector.shape_cast %307 : vector<8xf32> to vector<8x1xf32>
    %309 = arith.addf %306, %308 : vector<8x1xf32>
    %c7_246 = arith.constant 7 : index
    %c0_247 = arith.constant 0 : index
    %c0_248 = arith.constant 0 : index
    %310 = vector.load %arg13[%c7_246, %c0_247, %c0_248] : memref<8x8x1xf32, #tpu.memory_space<vmem>>, vector<1x8x1xf32>
    %311 = vector.shape_cast %310 : vector<1x8x1xf32> to vector<8x1xf32>
    %312 = vector.shape_cast %309 : vector<8x1xf32> to vector<1x8x1xf32>
    tpu.vector_store %arg13[%c7_246, %c0_247, %c0_248], %312 {strides = array<i32>} : memref<8x8x1xf32, #tpu.memory_space<vmem>>, vector<1x8x1xf32>,
    %c7_249 = arith.constant 7 : index
    %c0_250 = arith.constant 0 : index
    %c0_251 = arith.constant 0 : index
    %313 = vector.load %arg14[%c7_249, %c0_250, %c0_251] : memref<8x8x8xf32, #tpu.memory_space<vmem>>, vector<1x8x8xf32>
    %314 = vector.shape_cast %313 : vector<1x8x8xf32> to vector<8x8xf32>
    %315 = vector.broadcast %300 : vector<8x1xf32> to vector<8x8xf32>
    %316 = arith.mulf %315, %314 : vector<8x8xf32>
    %cst_252 = arith.constant dense<0.000000e+00> : vector<8x8xf32>
    %317 = tpu.matmul %303, %290, %cst_252 {dimension_numbers = #tpu.dot_dimension_numbers<[1], [0], [0], [1], [0, 0, 1, 1], [], []>} : vector<8x16xf32>, vector<16x8xf32>, vector<8x8xf32> -> vector<8x8xf32>
    %318 = arith.addf %316, %317 : vector<8x8xf32>
    %c7_253 = arith.constant 7 : index
    %c0_254 = arith.constant 0 : index
    %c0_255 = arith.constant 0 : index
    %319 = vector.load %arg14[%c7_253, %c0_254, %c0_255] : memref<8x8x8xf32, #tpu.memory_space<vmem>>, vector<1x8x8xf32>
    %320 = vector.shape_cast %319 : vector<1x8x8xf32> to vector<8x8xf32>
    %321 = vector.shape_cast %318 : vector<8x8xf32> to vector<1x8x8xf32>
    tpu.vector_store %arg14[%c7_253, %c0_254, %c0_255], %321 {strides = array<i32>} : memref<8x8x8xf32, #tpu.memory_space<vmem>>, vector<1x8x8xf32>,
    %c7_256 = arith.constant 7 : index
    %c0_257 = arith.constant 0 : index
    %c0_258 = arith.constant 0 : index
    %322 = vector.load %arg12[%c7_256, %c0_257, %c0_258] : memref<8x8x1xf32, #tpu.memory_space<vmem>>, vector<1x8x1xf32>
    %323 = vector.shape_cast %322 : vector<1x8x1xf32> to vector<8x1xf32>
    %324 = vector.shape_cast %298 : vector<8x1xf32> to vector<1x8x1xf32>
    tpu.vector_store %arg12[%c7_256, %c0_257, %c0_258], %324 {strides = array<i32>} : memref<8x8x1xf32, #tpu.memory_space<vmem>>, vector<1x8x1xf32>,
    %c0_i32_259 = arith.constant 0 : i32
    %325 = arith.cmpi eq, %arg2, %c0_i32_259 : i32
    %326 = arith.extui %325 : i1 to i32
    %c0_i32_260 = arith.constant 0 : i32
    %327 = arith.cmpi ne, %326, %c0_i32_260 : i32
    scf.if %327 {
      %cst_261 = arith.constant 0.000000e+00 : f32
      %328 = vector.broadcast %cst_261 : f32 to vector<8x64xf32>
      %c0_262 = arith.constant 0 : index
      %c0_263 = arith.constant 0 : index
      %c0_264 = arith.constant 0 : index
      %329 = vector.load %arg13[%c0_262, %c0_263, %c0_264] : memref<8x8x1xf32, #tpu.memory_space<vmem>>, vector<1x8x1xf32>
      %330 = vector.shape_cast %329 : vector<1x8x1xf32> to vector<8x1xf32>
      %331 = tpu.reciprocal %330 {approx = true} : vector<8x1xf32> -> vector<8x1xf32>
      %c0_265 = arith.constant 0 : index
      %c0_266 = arith.constant 0 : index
      %c0_267 = arith.constant 0 : index
      %332 = vector.load %arg14[%c0_265, %c0_266, %c0_267] : memref<8x8x8xf32, #tpu.memory_space<vmem>>, vector<1x8x8xf32>
      %333 = vector.shape_cast %332 : vector<1x8x8xf32> to vector<8x8xf32>
      %334 = vector.broadcast %331 : vector<8x1xf32> to vector<8x8xf32>
      %335 = arith.mulf %333, %334 : vector<8x8xf32>
      %c0_268 = arith.constant 0 : index
      %c0_269 = arith.constant 0 : index
      %c0_270 = arith.constant 0 : index
      %336 = vector.load %arg8[%c0_268, %c0_269, %c0_270] : memref<8x8x64xf32, #tpu.memory_space<vmem>>, vector<1x8x64xf32>
      %337 = vector.shape_cast %336 : vector<1x8x64xf32> to vector<8x64xf32>
      %cst_271 = arith.constant dense<0.000000e+00> : vector<8x64xf32>
      %338 = tpu.matmul %335, %337, %cst_271 {dimension_numbers = #tpu.dot_dimension_numbers<[1], [0], [0], [1], [0, 0, 1, 1], [], []>} : vector<8x8xf32>, vector<8x64xf32>, vector<8x64xf32> -> vector<8x64xf32>
      %339 = arith.addf %328, %338 : vector<8x64xf32>
      %c1_272 = arith.constant 1 : index
      %c0_273 = arith.constant 0 : index
      %c0_274 = arith.constant 0 : index
      %340 = vector.load %arg13[%c1_272, %c0_273, %c0_274] : memref<8x8x1xf32, #tpu.memory_space<vmem>>, vector<1x8x1xf32>
      %341 = vector.shape_cast %340 : vector<1x8x1xf32> to vector<8x1xf32>
      %342 = tpu.reciprocal %341 {approx = true} : vector<8x1xf32> -> vector<8x1xf32>
      %c1_275 = arith.constant 1 : index
      %c0_276 = arith.constant 0 : index
      %c0_277 = arith.constant 0 : index
      %343 = vector.load %arg14[%c1_275, %c0_276, %c0_277] : memref<8x8x8xf32, #tpu.memory_space<vmem>>, vector<1x8x8xf32>
      %344 = vector.shape_cast %343 : vector<1x8x8xf32> to vector<8x8xf32>
      %345 = vector.broadcast %342 : vector<8x1xf32> to vector<8x8xf32>
      %346 = arith.mulf %344, %345 : vector<8x8xf32>
      %c1_278 = arith.constant 1 : index
      %c0_279 = arith.constant 0 : index
      %c0_280 = arith.constant 0 : index
      %347 = vector.load %arg8[%c1_278, %c0_279, %c0_280] : memref<8x8x64xf32, #tpu.memory_space<vmem>>, vector<1x8x64xf32>
      %348 = vector.shape_cast %347 : vector<1x8x64xf32> to vector<8x64xf32>
      %cst_281 = arith.constant dense<0.000000e+00> : vector<8x64xf32>
      %349 = tpu.matmul %346, %348, %cst_281 {dimension_numbers = #tpu.dot_dimension_numbers<[1], [0], [0], [1], [0, 0, 1, 1], [], []>} : vector<8x8xf32>, vector<8x64xf32>, vector<8x64xf32> -> vector<8x64xf32>
      %350 = arith.addf %339, %349 : vector<8x64xf32>
      %c2_282 = arith.constant 2 : index
      %c0_283 = arith.constant 0 : index
      %c0_284 = arith.constant 0 : index
      %351 = vector.load %arg13[%c2_282, %c0_283, %c0_284] : memref<8x8x1xf32, #tpu.memory_space<vmem>>, vector<1x8x1xf32>
      %352 = vector.shape_cast %351 : vector<1x8x1xf32> to vector<8x1xf32>
      %353 = tpu.reciprocal %352 {approx = true} : vector<8x1xf32> -> vector<8x1xf32>
      %c2_285 = arith.constant 2 : index
      %c0_286 = arith.constant 0 : index
      %c0_287 = arith.constant 0 : index
      %354 = vector.load %arg14[%c2_285, %c0_286, %c0_287] : memref<8x8x8xf32, #tpu.memory_space<vmem>>, vector<1x8x8xf32>
      %355 = vector.shape_cast %354 : vector<1x8x8xf32> to vector<8x8xf32>
      %356 = vector.broadcast %353 : vector<8x1xf32> to vector<8x8xf32>
      %357 = arith.mulf %355, %356 : vector<8x8xf32>
      %c2_288 = arith.constant 2 : index
      %c0_289 = arith.constant 0 : index
      %c0_290 = arith.constant 0 : index
      %358 = vector.load %arg8[%c2_288, %c0_289, %c0_290] : memref<8x8x64xf32, #tpu.memory_space<vmem>>, vector<1x8x64xf32>
      %359 = vector.shape_cast %358 : vector<1x8x64xf32> to vector<8x64xf32>
      %cst_291 = arith.constant dense<0.000000e+00> : vector<8x64xf32>
      %360 = tpu.matmul %357, %359, %cst_291 {dimension_numbers = #tpu.dot_dimension_numbers<[1], [0], [0], [1], [0, 0, 1, 1], [], []>} : vector<8x8xf32>, vector<8x64xf32>, vector<8x64xf32> -> vector<8x64xf32>
      %361 = arith.addf %350, %360 : vector<8x64xf32>
      %c3_292 = arith.constant 3 : index
      %c0_293 = arith.constant 0 : index
      %c0_294 = arith.constant 0 : index
      %362 = vector.load %arg13[%c3_292, %c0_293, %c0_294] : memref<8x8x1xf32, #tpu.memory_space<vmem>>, vector<1x8x1xf32>
      %363 = vector.shape_cast %362 : vector<1x8x1xf32> to vector<8x1xf32>
      %364 = tpu.reciprocal %363 {approx = true} : vector<8x1xf32> -> vector<8x1xf32>
      %c3_295 = arith.constant 3 : index
      %c0_296 = arith.constant 0 : index
      %c0_297 = arith.constant 0 : index
      %365 = vector.load %arg14[%c3_295, %c0_296, %c0_297] : memref<8x8x8xf32, #tpu.memory_space<vmem>>, vector<1x8x8xf32>
      %366 = vector.shape_cast %365 : vector<1x8x8xf32> to vector<8x8xf32>
      %367 = vector.broadcast %364 : vector<8x1xf32> to vector<8x8xf32>
      %368 = arith.mulf %366, %367 : vector<8x8xf32>
      %c3_298 = arith.constant 3 : index
      %c0_299 = arith.constant 0 : index
      %c0_300 = arith.constant 0 : index
      %369 = vector.load %arg8[%c3_298, %c0_299, %c0_300] : memref<8x8x64xf32, #tpu.memory_space<vmem>>, vector<1x8x64xf32>
      %370 = vector.shape_cast %369 : vector<1x8x64xf32> to vector<8x64xf32>
      %cst_301 = arith.constant dense<0.000000e+00> : vector<8x64xf32>
      %371 = tpu.matmul %368, %370, %cst_301 {dimension_numbers = #tpu.dot_dimension_numbers<[1], [0], [0], [1], [0, 0, 1, 1], [], []>} : vector<8x8xf32>, vector<8x64xf32>, vector<8x64xf32> -> vector<8x64xf32>
      %372 = arith.addf %361, %371 : vector<8x64xf32>
      %c4_302 = arith.constant 4 : index
      %c0_303 = arith.constant 0 : index
      %c0_304 = arith.constant 0 : index
      %373 = vector.load %arg13[%c4_302, %c0_303, %c0_304] : memref<8x8x1xf32, #tpu.memory_space<vmem>>, vector<1x8x1xf32>
      %374 = vector.shape_cast %373 : vector<1x8x1xf32> to vector<8x1xf32>
      %375 = tpu.reciprocal %374 {approx = true} : vector<8x1xf32> -> vector<8x1xf32>
      %c4_305 = arith.constant 4 : index
      %c0_306 = arith.constant 0 : index
      %c0_307 = arith.constant 0 : index
      %376 = vector.load %arg14[%c4_305, %c0_306, %c0_307] : memref<8x8x8xf32, #tpu.memory_space<vmem>>, vector<1x8x8xf32>
      %377 = vector.shape_cast %376 : vector<1x8x8xf32> to vector<8x8xf32>
      %378 = vector.broadcast %375 : vector<8x1xf32> to vector<8x8xf32>
      %379 = arith.mulf %377, %378 : vector<8x8xf32>
      %c4_308 = arith.constant 4 : index
      %c0_309 = arith.constant 0 : index
      %c0_310 = arith.constant 0 : index
      %380 = vector.load %arg8[%c4_308, %c0_309, %c0_310] : memref<8x8x64xf32, #tpu.memory_space<vmem>>, vector<1x8x64xf32>
      %381 = vector.shape_cast %380 : vector<1x8x64xf32> to vector<8x64xf32>
      %cst_311 = arith.constant dense<0.000000e+00> : vector<8x64xf32>
      %382 = tpu.matmul %379, %381, %cst_311 {dimension_numbers = #tpu.dot_dimension_numbers<[1], [0], [0], [1], [0, 0, 1, 1], [], []>} : vector<8x8xf32>, vector<8x64xf32>, vector<8x64xf32> -> vector<8x64xf32>
      %383 = arith.addf %372, %382 : vector<8x64xf32>
      %c5_312 = arith.constant 5 : index
      %c0_313 = arith.constant 0 : index
      %c0_314 = arith.constant 0 : index
      %384 = vector.load %arg13[%c5_312, %c0_313, %c0_314] : memref<8x8x1xf32, #tpu.memory_space<vmem>>, vector<1x8x1xf32>
      %385 = vector.shape_cast %384 : vector<1x8x1xf32> to vector<8x1xf32>
      %386 = tpu.reciprocal %385 {approx = true} : vector<8x1xf32> -> vector<8x1xf32>
      %c5_315 = arith.constant 5 : index
      %c0_316 = arith.constant 0 : index
      %c0_317 = arith.constant 0 : index
      %387 = vector.load %arg14[%c5_315, %c0_316, %c0_317] : memref<8x8x8xf32, #tpu.memory_space<vmem>>, vector<1x8x8xf32>
      %388 = vector.shape_cast %387 : vector<1x8x8xf32> to vector<8x8xf32>
      %389 = vector.broadcast %386 : vector<8x1xf32> to vector<8x8xf32>
      %390 = arith.mulf %388, %389 : vector<8x8xf32>
      %c5_318 = arith.constant 5 : index
      %c0_319 = arith.constant 0 : index
      %c0_320 = arith.constant 0 : index
      %391 = vector.load %arg8[%c5_318, %c0_319, %c0_320] : memref<8x8x64xf32, #tpu.memory_space<vmem>>, vector<1x8x64xf32>
      %392 = vector.shape_cast %391 : vector<1x8x64xf32> to vector<8x64xf32>
      %cst_321 = arith.constant dense<0.000000e+00> : vector<8x64xf32>
      %393 = tpu.matmul %390, %392, %cst_321 {dimension_numbers = #tpu.dot_dimension_numbers<[1], [0], [0], [1], [0, 0, 1, 1], [], []>} : vector<8x8xf32>, vector<8x64xf32>, vector<8x64xf32> -> vector<8x64xf32>
      %394 = arith.addf %383, %393 : vector<8x64xf32>
      %c6_322 = arith.constant 6 : index
      %c0_323 = arith.constant 0 : index
      %c0_324 = arith.constant 0 : index
      %395 = vector.load %arg13[%c6_322, %c0_323, %c0_324] : memref<8x8x1xf32, #tpu.memory_space<vmem>>, vector<1x8x1xf32>
      %396 = vector.shape_cast %395 : vector<1x8x1xf32> to vector<8x1xf32>
      %397 = tpu.reciprocal %396 {approx = true} : vector<8x1xf32> -> vector<8x1xf32>
      %c6_325 = arith.constant 6 : index
      %c0_326 = arith.constant 0 : index
      %c0_327 = arith.constant 0 : index
      %398 = vector.load %arg14[%c6_325, %c0_326, %c0_327] : memref<8x8x8xf32, #tpu.memory_space<vmem>>, vector<1x8x8xf32>
      %399 = vector.shape_cast %398 : vector<1x8x8xf32> to vector<8x8xf32>
      %400 = vector.broadcast %397 : vector<8x1xf32> to vector<8x8xf32>
      %401 = arith.mulf %399, %400 : vector<8x8xf32>
      %c6_328 = arith.constant 6 : index
      %c0_329 = arith.constant 0 : index
      %c0_330 = arith.constant 0 : index
      %402 = vector.load %arg8[%c6_328, %c0_329, %c0_330] : memref<8x8x64xf32, #tpu.memory_space<vmem>>, vector<1x8x64xf32>
      %403 = vector.shape_cast %402 : vector<1x8x64xf32> to vector<8x64xf32>
      %cst_331 = arith.constant dense<0.000000e+00> : vector<8x64xf32>
      %404 = tpu.matmul %401, %403, %cst_331 {dimension_numbers = #tpu.dot_dimension_numbers<[1], [0], [0], [1], [0, 0, 1, 1], [], []>} : vector<8x8xf32>, vector<8x64xf32>, vector<8x64xf32> -> vector<8x64xf32>
      %405 = arith.addf %394, %404 : vector<8x64xf32>
      %c7_332 = arith.constant 7 : index
      %c0_333 = arith.constant 0 : index
      %c0_334 = arith.constant 0 : index
      %406 = vector.load %arg13[%c7_332, %c0_333, %c0_334] : memref<8x8x1xf32, #tpu.memory_space<vmem>>, vector<1x8x1xf32>
      %407 = vector.shape_cast %406 : vector<1x8x1xf32> to vector<8x1xf32>
      %408 = tpu.reciprocal %407 {approx = true} : vector<8x1xf32> -> vector<8x1xf32>
      %c7_335 = arith.constant 7 : index
      %c0_336 = arith.constant 0 : index
      %c0_337 = arith.constant 0 : index
      %409 = vector.load %arg14[%c7_335, %c0_336, %c0_337] : memref<8x8x8xf32, #tpu.memory_space<vmem>>, vector<1x8x8xf32>
      %410 = vector.shape_cast %409 : vector<1x8x8xf32> to vector<8x8xf32>
      %411 = vector.broadcast %408 : vector<8x1xf32> to vector<8x8xf32>
      %412 = arith.mulf %410, %411 : vector<8x8xf32>
      %c7_338 = arith.constant 7 : index
      %c0_339 = arith.constant 0 : index
      %c0_340 = arith.constant 0 : index
      %413 = vector.load %arg8[%c7_338, %c0_339, %c0_340] : memref<8x8x64xf32, #tpu.memory_space<vmem>>, vector<1x8x64xf32>
      %414 = vector.shape_cast %413 : vector<1x8x64xf32> to vector<8x64xf32>
      %cst_341 = arith.constant dense<0.000000e+00> : vector<8x64xf32>
      %415 = tpu.matmul %412, %414, %cst_341 {dimension_numbers = #tpu.dot_dimension_numbers<[1], [0], [0], [1], [0, 0, 1, 1], [], []>} : vector<8x8xf32>, vector<8x64xf32>, vector<8x64xf32> -> vector<8x64xf32>
      %416 = arith.addf %405, %415 : vector<8x64xf32>
      %c0_342 = arith.constant 0 : index
      %c0_343 = arith.constant 0 : index
      %417 = vector.load %arg9[%c0_342, %c0_343] : memref<1x64xf32, #tpu.memory_space<vmem>>, vector<1x64xf32>
      %418 = vector.broadcast %417 : vector<1x64xf32> to vector<8x64xf32>
      %419 = arith.addf %416, %418 : vector<8x64xf32>
      %c0_344 = arith.constant 0 : index
      %c0_345 = arith.constant 0 : index
      %c0_346 = arith.constant 0 : index
      %420 = vector.load %arg10[%c0_344, %c0_345, %c0_346] : memref<1x8x64xf32, #tpu.memory_space<vmem>>, vector<1x8x64xf32>
      %421 = vector.shape_cast %420 : vector<1x8x64xf32> to vector<8x64xf32>
      %422 = vector.shape_cast %419 : vector<8x64xf32> to vector<1x8x64xf32>
      tpu.vector_store %arg10[%c0_344, %c0_345, %c0_346], %422 {strides = array<i32>} : memref<1x8x64xf32, #tpu.memory_space<vmem>>, vector<1x8x64xf32>,
    } else {
    }
    return
  }
  func.func @transform_0(%arg0: i32, %arg1: i32, %arg2: i32) -> (i32, i32, i32) {
    %c0_i32 = arith.constant 0 : i32
    %c0_i32_0 = arith.constant 0 : i32
    return %arg0, %arg1, %c0_i32 : i32, i32, i32
  }
  func.func @transform_1(%arg0: i32, %arg1: i32, %arg2: i32) -> (i32, i32, i32) {
    %c0_i32 = arith.constant 0 : i32
    %c0_i32_0 = arith.constant 0 : i32
    return %arg0, %arg2, %c0_i32 : i32, i32, i32
  }
  func.func @transform_2(%arg0: i32, %arg1: i32, %arg2: i32) -> (i32, i32, i32) {
    %c0_i32 = arith.constant 0 : i32
    %c0_i32_0 = arith.constant 0 : i32
    %c0_i32_1 = arith.constant 0 : i32
    %c0_i32_2 = arith.constant 0 : i32
    return %c0_i32, %c0_i32_0, %c0_i32_1 : i32, i32, i32
  }
  func.func @transform_3(%arg0: i32, %arg1: i32, %arg2: i32) -> (i32, i32, i32) {
    %c0_i32 = arith.constant 0 : i32
    %c0_i32_0 = arith.constant 0 : i32
    %c0_i32_1 = arith.constant 0 : i32
    %c0_i32_2 = arith.constant 0 : i32
    return %c0_i32, %c0_i32_0, %c0_i32_1 : i32, i32, i32
  }
  func.func @transform_4(%arg0: i32, %arg1: i32, %arg2: i32) -> (i32, i32, i32) {
    %c0_i32 = arith.constant 0 : i32
    %c0_i32_0 = arith.constant 0 : i32
    %c0_i32_1 = arith.constant 0 : i32
    %c0_i32_2 = arith.constant 0 : i32
    return %c0_i32, %c0_i32_0, %c0_i32_1 : i32, i32, i32
  }
  func.func @transform_5(%arg0: i32, %arg1: i32, %arg2: i32) -> (i32, i32, i32) {
    %c0_i32 = arith.constant 0 : i32
    %c0_i32_0 = arith.constant 0 : i32
    %c0_i32_1 = arith.constant 0 : i32
    %c0_i32_2 = arith.constant 0 : i32
    return %c0_i32, %c0_i32_0, %c0_i32_1 : i32, i32, i32
  }
  func.func @transform_6(%arg0: i32, %arg1: i32, %arg2: i32) -> (i32, i32) {
    %c0_i32 = arith.constant 0 : i32
    %c0_i32_0 = arith.constant 0 : i32
    %c0_i32_1 = arith.constant 0 : i32
    return %c0_i32, %c0_i32_0 : i32, i32
  }
  func.func @transform_7(%arg0: i32, %arg1: i32, %arg2: i32) -> (i32, i32, i32) {
    %c0_i32 = arith.constant 0 : i32
    %c0_i32_0 = arith.constant 0 : i32
    return %arg0, %arg1, %c0_i32 : i32, i32, i32
  }
}

</mosaic_0001>

<bundles_post_ra>
// kernel: tpu_custom_call.1
= control target key start
LH: loop header
LB: loop body
LE: loop exit
PB: predicated region body
PF: predicated region fallthrough
CT: control target
= control target key end

     0   :  { %12 = vsyncpa [#allocation7], 0  ;;  %s3346_s0 = inlined_call_operand.vmem [shape: f32[2,8,32], index: 0, kind: input, shape index: {}]   ;;  %s3347_s1 = inlined_call_operand.vmem [shape: f32[2,16,32], index: 1, kind: input, shape index: {}]   ;;  %s3348_s2 = inlined_call_operand.vmem [shape: f32[8,32,8], index: 2, kind: input, shape index: {}]   ;;  %s3349_s3 = inlined_call_operand.vmem [shape: f32[8,32,8], index: 3, kind: input, shape index: {}]   ;;  %s3350_s4 = inlined_call_operand.vmem [shape: f32[8,32,8], index: 4, kind: input, shape index: {}]   ;;  %s3351_s5 = inlined_call_operand.vmem [shape: f32[8,8,64], index: 5, kind: input, shape index: {}]   ;;  %s3352_s6 = inlined_call_operand.vmem [shape: f32[1,64], index: 6, kind: input, shape index: {}]   ;;  %s3353_s7 = inlined_call_operand.hbm [shape: f32[2,8,64], index: 7, kind: output, shape index: {}]  }
   0x1   :  { %14 = vsyncpa [#allocation7 + $0x1], 0  ;;  %s2587_s24 = smov 0   ;;  %s2589_s25 = smov 0  }
   0x2   :  { %s2591_s26 = smov 0   ;;  %s2593_s27 = smov 0  }
   0x3   :  { %s2595_s28 = smov 0   ;;  %s2597_s29 = smov 0  }
   0x4 LB: > { %s2169_s30 = sadd.s32 4294967295, %s2542_s29   ;;  %s2170_s8 = sadd.s32 4294967294, %s2542_s29   ;;  %s2542_s29 = sphi %s2597_s29, %s20_s29   ;;  %s2538_s28 = sphi %s2595_s28, %s3360_s28   ;;  %s2534_s27 = sphi %s2593_s27, %s3359_s27   ;;  %s2530_s26 = sphi %s2591_s26, %s3358_s26   ;;  %s2526_s25 = sphi %s2589_s25, %s3357_s25   ;;  %s2522_s24 = sphi %s2587_s24, %s3356_s24  }
   0x5   : > { %s39_s9 = sadd.s32 1, %s2538_s28  ;;  %s209_s10 = sadd.s32 1, %s2530_s26 }
   0x6   : > { %p41_p0 = scmp.ge.s32.totalorder %s39_s9, 2  ;;  %p219_p1 = scmp.ne.s32.totalorder %s2530_s26, %s2526_s25 }
   0x7   : > { %p220_p2 = scmp.eq.s32.totalorder %s2169_s30, 1  ;;  %p225_p3 = scmp.ne.s32.totalorder %s2526_s25, %s2522_s24 }
   0x8   : > { %s3362_s9 = smov (%p41_p0, %s39_s9), 0  ;;  %p226_p5 = scmp.eq.s32.totalorder %s2170_s8, 1 }
   0x9   : > { %p2627_p4 = por %p220_p2, %p219_p1  ;;  %s204_s12 = ssub.s32 %s2538_s28, %s3362_s9 }
   0xa   : > { %p2173_p6 = scmp.ge.s32.totalorder %s2542_s29, 1  ;;  %p207_p7 = scmp.eq.s32.totalorder %s204_s12, 0 }
   0xb   : > { %p2634_p8 = por %p226_p5, %p225_p3  ;;  %p282_p9 = scmp.lt.s32.totalorder %s2542_s29, 3 }
   0xc   : > { %s2640_s14 = scalar_select %p207_p7, %s2530_s26, %s209_s10  }
   0xd   : > { %p283_p10 = pnand %p2173_p6, %p282_p9 }
   0xe   : > { %p325_p11 = scmp.lt.s32.totalorder (!%p283_p10), %s2534_s27, 1  ;;  %s322_s8 = sand.u32 (!%p283_p10), 1, %s2526_s25  }
   0xf   : > { %286 = sbr.rel (%p283_p10) target bundleno = 1989 (0x7c5), region = 48 }
  0x14   : > { %v350_v0 = vld [vmem:[%s3348_s2 + $0x18] sm:$0xff]  ;;  %v349_v1 = vld [vmem:[%s3348_s2 + $0x10] sm:$0xff]  ;;  %v348_v2 = vld [vmem:[%s3348_s2 + $0x8] sm:$0xff]  ;;  %s326_s21 = scalar_select %p325_p11, %s2534_s27, 1  ;;  %vm351_vm0 = vcmask 261120   ;;  %vm376_vm1 = vcmask 64512  }
  0x15   : > { %367 = vmatpush.msra.mxu0 %v350_v0  ;;  %v347_v3 = vld [vmem:[%s3348_s2] sm:$0xff]  ;;  %v2197_v5 = vld [vmem:[%s3348_s2 + $0x98] sm:$0xff]  ;;  %v2196_v6 = vld [vmem:[%s3348_s2 + $0x90] sm:$0xff]  ;;  %vm694_vm2 = vcmask 130048   ;;  %vm574_vm3 = vcmask 7168   ;;  %v2544_v49 = vmov -inf  }
  0x16   : > { %s2175_s30 = sshll.u32 %s326_s21, 3  ;;  %v2195_v7 = vld [vmem:[%s3348_s2 + $0x88] sm:$0xff]  ;;  %v2194_v8 = vld [vmem:[%s3348_s2 + $0x80] sm:$0xff]  ;;  %v604_v9 = vld [vmem:[%s3349_s3 + $0x18] sm:$0xff]  ;;  %s2353_s10 = sshll.u32 %s326_s21, 4  ;;  %575 = vst.msk [vmem:[#allocation3] sm:$0xff] %vm574_vm3, %v2544_v49 }
  0x17   : > { %368 = vmatpush.msra.mxu0 %v349_v1  ;;  %s331_s12 = scalar_lea.vmem %s3346_s0, %s2175_s30  ;;  %v603_v10 = vld [vmem:[%s3349_s3 + $0x10] sm:$0xff]  ;;  %s340_s18 = scalar_lea.vmem %s3347_s1, %s2353_s10  ;;  %v602_v11 = vld [vmem:[%s3349_s3 + $0x8] sm:$0xff]  ;;  %v601_v12 = vld [vmem:[%s3349_s3] sm:$0xff]  ;;  %576 = vst.msk [vmem:[#allocation3 + $0x8] sm:$0xff] %vm574_vm3, %v2544_v49  ;;  %v2545_v62 = vmov 0   ;;  %v2546_v63 = vmov 0.0  }
  0x18   : > { %v2659_v4 = vld [vmem:[%s331_s12] sm:$0xff]  ;;  %v2696_v14 = vld [vmem:[%s340_s18 + $0x8] sm:$0xff]  ;;  %v2187_v15 = vld [vmem:[%s3348_s2 + $0x58] sm:$0xff]  ;;  %577 = vst.msk [vmem:[#allocation3 + $0x10] sm:$0xff] %vm574_vm3, %v2544_v49  ;;  %2412 = vset.pattern.permute.xlu0 %v2545_v62  ;;  %2413 = vset.pattern.permute.xlu1 %v2545_v62  ;;  %s2174_s10 = sshll.u32 %s322_s8, 3  ;;  %s2350_s12 = sshll.u32 %s2534_s27, 3 }
  0x19   : > { %369 = vmatpush.msra.mxu0 %v348_v2  ;;  %v2692_v13 = vld [vmem:[%s340_s18] sm:$0xff]  ;;  %423 = vmatpush.msra.mxu2 %v2187_v15  ;;  %v2186_v16 = vld [vmem:[%s3348_s2 + $0x50] sm:$0xff]  ;;  %v2185_v17 = vld [vmem:[%s3348_s2 + $0x48] sm:$0xff]  ;;  %578 = vst.msk [vmem:[#allocation3 + $0x18] sm:$0xff] %vm574_vm3, %v2544_v49  ;;  %s2072_s17 = scalar_lea.hbm %s3353_s7, %s2350_s12  ;;  %s324_s20 = scalar_lea.vmem [#allocation6], %s2174_s10  ;;  %vm2058_vm4 = vcmask 523264  }
  0x1a   : > { %v2184_v18 = vld [vmem:[%s3348_s2 + $0x40] sm:$0xff]  ;;  %v2207_v19 = vld [vmem:[%s3348_s2 + $0xd8] sm:$0xff]  ;;  %v2206_v20 = vld [vmem:[%s3348_s2 + $0xd0] sm:$0xff]  ;;  %579 = vst.msk [vmem:[#allocation3 + $0x20] sm:$0xff] %vm574_vm3, %v2544_v49  ;;  %2414 = vset.pattern.permute.xlu2 %v2545_v62  ;;  %s2074_s22 = sshll.u32 %s324_s20, 4  ;;  %s2076_s21 = sshll.u32 %s2072_s17, 4  ;;  %s2075_s22 = int_to_ptr.vmem [resolvable:$true] %s2074_s22  ;;  %s2077_s21 = int_to_ptr.hbm [resolvable:$true] %s2076_s21 }
  0x1b   : > { %370 = vmatpush.msra.mxu0 %v347_v3  ;;  %424 = vmatpush.msra.mxu2 %v2186_v16  ;;  %v2205_v21 = vld [vmem:[%s3348_s2 + $0xc8] sm:$0xff]  ;;  %v2204_v22 = vld [vmem:[%s3348_s2 + $0xc0] sm:$0xff]  ;;  %v2182_v26 = vld [vmem:[%s3348_s2 + $0x38] sm:$0xff]  ;;  %580 = vst.msk [vmem:[#allocation3 + $0x28] sm:$0xff] %vm574_vm3, %v2544_v49  ;;  %s2061_s27 = scalar_lea.sflag [#allocation7], %s322_s8  ;;  %s2478_s23 = sshra.s32 %s2077_s21, 4  ;;  %s2479_s23 = int_to_ptr.hbm [resolvable:$true] %s2478_s23 }
  0x1c   : > { %2178 = vmatmul.msk.f32.vlgmr.msra.gmra.mxu0 %vm351_vm0, %v2659_v4  ;;  %v2181_v27 = vld [vmem:[%s3348_s2 + $0x30] sm:$0xff]  ;;  %395 = vmatpush.msra.mxu1 %v2182_v26  ;;  %v2180_v29 = vld [vmem:[%s3348_s2 + $0x28] sm:$0xff]  ;;  %v2179_v31 = vld [vmem:[%s3348_s2 + $0x20] sm:$0xff]  ;;  %581 = vst.msk [vmem:[#allocation3 + $0x30] sm:$0xff] %vm574_vm3, %v2544_v49  ;;  %s2480_s30 = scalar_lea.hbm %s2479_s23, 8  ;;  %s2484_s10 = scalar_lea.hbm %s3353_s7, 16 }
  0x1d   : > { %479 = vmatpush.msrb.mxu0 %v2197_v5  ;;  %425 = vmatpush.msra.mxu2 %v2185_v17  ;;  %v2225_v33 = vld [vmem:[%s3349_s3 + $0x38] sm:$0xff]  ;;  %v2224_v34 = vld [vmem:[%s3349_s3 + $0x30] sm:$0xff]  ;;  %v2223_v36 = vld [vmem:[%s3349_s3 + $0x28] sm:$0xff]  ;;  %582 = vst.msk [vmem:[#allocation3 + $0x38] sm:$0xff] %vm574_vm3, %v2544_v49  ;;  %p2481_p12 = scmp.ne.s32.totalorder %s2479_s23, %s2480_s30  ;;  %p2485_p1 = scmp.lt.s32.totalorder %s2479_s23, %s3353_s7 }
  0x1e   : > { %396 = vmatpush.msra.mxu1 %v2181_v27  ;;  %v2222_v37 = vld [vmem:[%s3349_s3 + $0x20] sm:$0xff]  ;;  %v2202_v47 = vld [vmem:[%s3348_s2 + $0xb8] sm:$0xff]  ;;  %v2201_v48 = vld [vmem:[%s3348_s2 + $0xb0] sm:$0xff]  ;;  %584 = vst.msk [vmem:[#allocation4 + $0x8] sm:$0xff] %vm574_vm3, %v2546_v63  ;;  %p2486_p2 = scmp.lt.s32.totalorder %s2484_s10, %s2480_s30 }
  0x1f   : > { %480 = vmatpush.msrb.mxu0 %v2196_v6  ;;  %426 = vmatpush.msra.mxu2 %v2184_v18  ;;  %v2200_v50 = vld [vmem:[%s3348_s2 + $0xa8] sm:$0xff]  ;;  %v2199_v51 = vld [vmem:[%s3348_s2 + $0xa0] sm:$0xff]  ;;  %v638_v52 = vld [vmem:[%s3350_s4 + $0x18] sm:$0xff]  ;;  %583 = vst.msk [vmem:[#allocation4] sm:$0xff] %vm574_vm3, %v2546_v63  ;;  %p2482_p13 = pnand %p2481_p12, %p2627_p4 }
  0x20   : > { %2188 = vmatmul.msk.f32.vlgmr.msra.gmra.mxu2 %vm351_vm0, %v2659_v4  ;;  %397 = vmatpush.msra.mxu1 %v2180_v29  ;;  %v637_v54 = vld [vmem:[%s3350_s4 + $0x10] sm:$0xff]  ;;  %v636_v55 = vld [vmem:[%s3350_s4 + $0x8] sm:$0xff]  ;;  %v2241_v56 = vld [vmem:[%s3349_s3 + $0x58] sm:$0xff]  ;;  %585 = vst.msk [vmem:[#allocation4 + $0x10] sm:$0xff] %vm574_vm3, %v2546_v63  ;;  %p2487_p3 = por %p2486_p2, %p2485_p1 }
  0x21   : > { %481 = vmatpush.msrb.mxu0 %v2195_v7  ;;  %535 = vmatpush.msrb.mxu2 %v2207_v19  ;;  %v635_v57 = vld [vmem:[%s3350_s4] sm:$0xff]  ;;  %v2240_v59 = vld [vmem:[%s3349_s3 + $0x50] sm:$0xff]  ;;  %v2239_v60 = vld [vmem:[%s3349_s3 + $0x48] sm:$0xff]  ;;  %586 = vst.msk [vmem:[#allocation4 + $0x18] sm:$0xff] %vm574_vm3, %v2546_v63  ;;  %p2483_p0 = pneg %p2482_p13 }
  0x22   : > { %398 = vmatpush.msra.mxu1 %v2179_v31  ;;  %v2238_v61 = vld [vmem:[%s3349_s3 + $0x40] sm:$0xff]  ;;  %587 = vst.msk [vmem:[#allocation4 + $0x20] sm:$0xff] %vm574_vm3, %v2546_v63  ;;  %v2192_v5 = vld [vmem:[%s3348_s2 + $0x78] sm:$0xff]  ;;  %v2191_v6 = vld [vmem:[%s3348_s2 + $0x70] sm:$0xff] }
  0x23   : > { %482 = vmatpush.msrb.mxu0 %v2194_v8  ;;  %536 = vmatpush.msrb.mxu2 %v2206_v20  ;;  %588 = vst.msk [vmem:[#allocation4 + $0x28] sm:$0xff] %vm574_vm3, %v2546_v63  ;;  %v2843_v0 = vld [vmem:[#allocation3] sm:$0xff]  ;;  %v2190_v8 = vld [vmem:[%s3348_s2 + $0x68] sm:$0xff]  ;;  %v2212_v15 = vld [vmem:[%s3348_s2 + $0xf8] sm:$0xff]  ;;  %p2488_p5 = pnand %p2487_p3, %p2483_p0 }
  0x24   : > { %2198 = vmatmul.msk.f32.vlgmr.msrb.gmra.mxu0 %vm351_vm0, %v2659_v4  ;;  %2183 = vmatmul.msk.f32.vlgmr.msra.gmra.mxu1 %vm351_vm0, %v2659_v4  ;;  %589 = vst.msk [vmem:[#allocation4 + $0x30] sm:$0xff] %vm574_vm3, %v2546_v63  ;;  %v2211_v16 = vld [vmem:[%s3348_s2 + $0xf0] sm:$0xff]  ;;  %v2257_v19 = vld [vmem:[%s3349_s3 + $0x78] sm:$0xff]  ;;  %v2209_v26 = vld [vmem:[%s3348_s2 + $0xe0] sm:$0xff] }
  0x25   : > { %624 = vmatpush.msra.mxu0 %v604_v9  ;;  %537 = vmatpush.msrb.mxu2 %v2205_v21  ;;  %590 = vst.msk [vmem:[#allocation4 + $0x38] sm:$0xff] %vm574_vm3, %v2546_v63  ;;  %v2189_v9 = vld [vmem:[%s3348_s2 + $0x60] sm:$0xff]  ;;  %v2256_v20 = vld [vmem:[%s3349_s3 + $0x70] sm:$0xff] }
  0x26   : > { %507 = vmatpush.msrb.mxu1 %v2202_v47  ;;  %591 = vst.msk [vmem:[#allocation5] sm:$0xff] %vm376_vm1, %v2546_v63  ;;  %451 = vmatpush.msra.mxu3 %v2192_v5  ;;  %v2230_v29 = vld [vmem:[%s3350_s4 + $0x30] sm:$0xff]  ;;  %v2270_v49 = vld [vmem:[%s3349_s3 + $0x80] sm:$0xff] }
  0x27   : > { %625 = vmatpush.msra.mxu0 %v603_v10  ;;  %538 = vmatpush.msrb.mxu2 %v2204_v22  ;;  %592 = vst.msk [vmem:[#allocation5 + $0x8] sm:$0xff] %vm376_vm1, %v2546_v63  ;;  %v2255_v22 = vld [vmem:[%s3349_s3 + $0x68] sm:$0xff]  ;;  %v2272_v47 = vld [vmem:[%s3349_s3 + $0x90] sm:$0xff]  ;;  %v2244_v62 = vld [vmem:[%s3350_s4 + $0x40] sm:$0xff] }
  0x28   : > { %2208 = vmatmul.msk.f32.vlgmr.msrb.gmra.mxu2 %vm351_vm0, %v2659_v4  ;;  %508 = vmatpush.msrb.mxu1 %v2201_v48  ;;  %593 = vst.msk [vmem:[#allocation5 + $0x10] sm:$0xff] %vm376_vm1, %v2546_v63  ;;  %v2271_v48 = vld [vmem:[%s3349_s3 + $0x88] sm:$0xff] }
  0x29   : > { %626 = vmatpush.msra.mxu0 %v602_v11  ;;  %594 = vst.msk [vmem:[#allocation5 + $0x18] sm:$0xff] %vm376_vm1, %v2546_v63  ;;  %452 = vmatpush.msra.mxu3 %v2191_v6 }
  0x2a   : > { %509 = vmatpush.msrb.mxu1 %v2200_v50  ;;  %595 = vst.msk [vmem:[#allocation5 + $0x20] sm:$0xff] %vm376_vm1, %v2546_v63 }
  0x2b   : > { %627 = vmatpush.msra.mxu0 %v601_v12  ;;  %596 = vst.msk [vmem:[#allocation5 + $0x28] sm:$0xff] %vm376_vm1, %v2546_v63  ;;  %453 = vmatpush.msra.mxu3 %v2190_v8 }
  0x2c   : > { %2214 = vmatmul.msk.f32.vlgmr.msra.gmra.mxu0 %vm351_vm0, %v2692_v13  ;;  %510 = vmatpush.msrb.mxu1 %v2199_v51  ;;  %597 = vst.msk [vmem:[#allocation5 + $0x30] sm:$0xff] %vm376_vm1, %v2546_v63 }
  0x2d   : > { %2203 = vmatmul.msk.f32.vlgmr.msrb.gmra.mxu1 %vm351_vm0, %v2659_v4  ;;  %598 = vst.msk [vmem:[#allocation5 + $0x38] sm:$0xff] %vm376_vm1, %v2546_v63  ;;  %454 = vmatpush.msra.mxu3 %v2189_v9  ;;  %v2984_v63 = vld [vmem:[#allocation3 + $0x10] sm:$0xff] }
  0x2e   : > { %651 = vmatpush.msra.mxu1 %v638_v52  ;;  %2193 = vmatmul.msk.f32.vlgmr.msra.gmra.mxu3 %vm351_vm0, %v2659_v4 }
  0x2f   : > { %563 = vmatpush.msrb.mxu3 %v2212_v15 }
  0x30   : > { %652 = vmatpush.msra.mxu1 %v637_v54 }
  0x31   : > { %564 = vmatpush.msrb.mxu3 %v2211_v16  ;;  %v2287_v16 = vld [vmem:[%s3349_s3 + $0xa8] sm:$0xff] }
  0x32   : > { %653 = vmatpush.msra.mxu1 %v636_v55 }
  0x34   : > { %2215 = vmatmul.msk.f32.gmra.mxu0 %vm351_vm0, %v2696_v14  ;;  %654 = vmatpush.msra.mxu1 %v635_v57 }
  0x35   : > { %2216 = vmatmul.msk.f32.vlgmr.msra.gmra.mxu1 %vm351_vm0, %v2692_v13 }
  0x3d   : > { %2217 = vmatmul.msk.f32.gmra.mxu1 %vm351_vm0, %v2696_v14 }
  0x99   : > { %v372_v23 = vpop.f32.mrf.mxu0 }
  0x9a   : > { %v375_v24 = vmul.f32 0.35355338, %v372_v23  ;;  %v2254_v23 = vld [vmem:[%s3349_s3 + $0x60] sm:$0xff] }
  0x9c   : > { %377 = vst.msk [vmem:[#allocation2] sm:$0xff] %vm376_vm1, %v375_v24 }
  0xa1   : > { %v484_v25 = vpop.f32.mrf.mxu0  ;;  %v400_v42 = vpop.f32.mrf.mxu1 }
  0xa2   : > { %v487_v28 = vmul.f32 0.35355338, %v484_v25  ;;  %v403_v43 = vmul.f32 0.35355338, %v400_v42  ;;  %v2210_v25 = vld [vmem:[%s3348_s2 + $0xe8] sm:$0xff] }
  0xa3   : > { %v662_v35 = vld [vmem:[#allocation2] sm:$0xff]  ;;  %v428_v38 = vpop.f32.mrf.mxu2  ;;  %565 = vmatpush.msrb.mxu3 %v2210_v25 }
  0xa4   : > { %489 = vst.msk [vmem:[#allocation2 + $0x20] sm:$0xff] %vm376_vm1, %v487_v28  ;;  %v431_v39 = vmul.f32 0.35355338, %v428_v38  ;;  %v2231_v28 = vld [vmem:[%s3350_s4 + $0x38] sm:$0xff] }
  0xa5   : > { %405 = vst.msk [vmem:[#allocation2 + $0x8] sm:$0xff] %vm376_vm1, %v403_v43  ;;  %566 = vmatpush.msrb.mxu3 %v2209_v26  ;;  %v2262_v26 = vld [vmem:[%s3350_s4 + $0x70] sm:$0xff] }
  0xa6   : > { %433 = vst.msk [vmem:[#allocation2 + $0x10] sm:$0xff] %vm376_vm1, %v431_v39  ;;  %2213 = vmatmul.msk.f32.vlgmr.msrb.gmra.mxu3 %vm351_vm0, %v2659_v4  ;;  %v2228_v4 = vld [vmem:[%s3350_s4 + $0x20] sm:$0xff] }
  0xa9   : > { %v629_v30 = vpop.f32.mrf.mxu0 }
  0xaa   : > { %v512_v12 = vpop.f32.mrf.mxu1 }
  0xab   : > { %v540_v40 = vpop.f32.mrf.mxu2  ;;  %v515_v17 = vmul.f32 0.35355338, %v512_v12  ;;  %v2288_v12 = vld [vmem:[%s3349_s3 + $0xb0] sm:$0xff]  ;;  %v1246_v15 = vld [vmem:[#allocation2 + $0x20] sm:$0xff] }
  0xac   : > { %v543_v41 = vmul.f32 0.35355338, %v540_v40  ;;  %v808_v58 = vld [vmem:[#allocation2 + $0x8] sm:$0xff] }
  0xad   : > { %517 = vst.msk [vmem:[#allocation2 + $0x28] sm:$0xff] %vm376_vm1, %v515_v17  ;;  %v954_v21 = vld [vmem:[#allocation2 + $0x10] sm:$0xff]  ;;  %v2286_v17 = vld [vmem:[%s3349_s3 + $0xa0] sm:$0xff] }
  0xae   : > { %545 = vst.msk [vmem:[#allocation2 + $0x30] sm:$0xff] %vm376_vm1, %v543_v41 }
  0xb1   : > { %v632_v32 = vpop.f32.mrf.mxu0  ;;  %v456_v39 = vpop.f32.mrf.mxu3 }
  0xb2   : > { %2218 = vmatpush.xpose.msk.msra.mxu2 %vm376_vm1, %v632_v32  ;;  %v656_v24 = vpop.f32.mrf.mxu1  ;;  %v459_v40 = vmul.f32 0.35355338, %v456_v39 }
  0xb4   : > { %461 = vst.msk [vmem:[#allocation2 + $0x18] sm:$0xff] %vm376_vm1, %v459_v40  ;;  %v2305_v40 = vld [vmem:[%s3349_s3 + $0xd8] sm:$0xff] }
  0xb6   : > { %2219 = vmatpush.xpose.msk.msra.mxu2 %vm376_vm1, %v629_v30  ;;  %v2229_v30 = vld [vmem:[%s3350_s4 + $0x28] sm:$0xff] }
  0xb9   : > { %2220 = vmatmul.msk.f32.vlgmr.msra.gmra.mxu2 %vm376_vm1, %v662_v35  ;;  %v2926_v35 = vld [vmem:[#allocation3 + $0x8] sm:$0xff] }
  0xba   : > { %768 = vmatpush.msrb.mxu2 %v2225_v33  ;;  %v659_v27 = vpop.f32.mrf.mxu1 }
  0xbb   : > { %742 = vmatpush.msra.mxu3 %v659_v27  ;;  %v2261_v27 = vld [vmem:[%s3350_s4 + $0x68] sm:$0xff] }
  0xbc   : > { %769 = vmatpush.msrb.mxu2 %v2224_v34 }
  0xbd   : > { %743 = vmatpush.msra.mxu3 %v656_v24  ;;  %v2263_v24 = vld [vmem:[%s3350_s4 + $0x78] sm:$0xff] }
  0xbe   : > { %770 = vmatpush.msrb.mxu2 %v2223_v36 }
  0xbf   : > { %796 = vmatpush.msrb.mxu3 %v2231_v28  ;;  %v2260_v28 = vld [vmem:[%s3350_s4 + $0x60] sm:$0xff] }
  0xc0   : > { %771 = vmatpush.msrb.mxu2 %v2222_v37 }
  0xc1   : > { %2226 = vmatmul.msk.f32.vlgmr.msrb.gmra.mxu2 %vm351_vm0, %v2692_v13  ;;  %797 = vmatpush.msrb.mxu3 %v2230_v29  ;;  %v3040_v29 = vld [vmem:[#allocation3 + $0x18] sm:$0xff] }
  0xc3   : > { %798 = vmatpush.msrb.mxu3 %v2229_v30 }
  0xc5   : > { %799 = vmatpush.msrb.mxu3 %v2228_v4 }
  0xc9   : > { %2227 = vmatmul.msk.f32.gmra.mxu2 %vm351_vm0, %v2696_v14 }
 0x129   : > { %v568_v50 = vpop.f32.mrf.mxu3 }
 0x12a   : > { %v571_v51 = vmul.f32 0.35355338, %v568_v50  ;;  %v2277_v50 = vld [vmem:[%s3350_s4 + $0x88] sm:$0xff] }
 0x12c   : > { %573 = vst.msk [vmem:[#allocation2 + $0x38] sm:$0xff] %vm376_vm1, %v571_v51  ;;  %v2276_v51 = vld [vmem:[%s3350_s4 + $0x80] sm:$0xff] }
 0x13c   : > { %v2766_v44 = vpop.f32.mrf.mxu2 }
 0x13d   : > { %v695_v45 = vsel %vm694_vm2, %v2766_v44, -inf }
 0x13e   : > { %696 = vmax.xlane.f32.xlu0 %v695_v45  ;;  %v2273_v45 = vld [vmem:[%s3349_s3 + $0x98] sm:$0xff] }
 0x144   : > { %v773_v46 = vpop.f32.mrf.mxu2 }
 0x14c   : > { %v776_v53 = vpop.f32.mrf.mxu2 }
 0x14d   : > { %2234 = vmatpush.xpose.msk.msrb.mxu0 %vm376_vm1, %v776_v53 }
 0x151   : > { %2235 = vmatpush.xpose.msk.msrb.mxu0 %vm376_vm1, %v773_v46  ;;  %v1100_v46 = vld [vmem:[#allocation2 + $0x18] sm:$0xff] }
 0x154   : > { %2236 = vmatmul.msk.f32.vlgmr.msrb.gmra.mxu0 %vm376_vm1, %v808_v58  ;;  %v2247_v58 = vld [vmem:[%s3350_s4 + $0x58] sm:$0xff] }
 0x155   : > { %914 = vmatpush.msra.mxu0 %v2241_v56 }
 0x157   : > { %915 = vmatpush.msra.mxu0 %v2240_v59 }
 0x159   : > { %916 = vmatpush.msra.mxu0 %v2239_v60  ;;  %v2246_v60 = vld [vmem:[%s3350_s4 + $0x50] sm:$0xff] }
 0x15b   : > { %917 = vmatpush.msra.mxu0 %v2238_v61  ;;  %v2245_v61 = vld [vmem:[%s3350_s4 + $0x48] sm:$0xff] }
 0x15c   : > { %2242 = vmatmul.msk.f32.vlgmr.msra.gmra.mxu0 %vm351_vm0, %v2692_v13 }
 0x164   : > { %2243 = vmatmul.msk.f32.gmra.mxu0 %vm351_vm0, %v2696_v14 }
 0x1b1   : > { %v697_v1 = vpop.xlane.xlu0 %696 }
 0x1b2   : > { %v2846_v2 = vmax.f32 %v2843_v0, %v697_v1 }
 0x1b4   : > { %v699_v3 = vsub.f32 %v2843_v0, %v2846_v2  ;;  %750 = vst.msk [vmem:[#allocation3] sm:$0xff] %vm574_vm3, %v2846_v2  ;;  %704 = vperm.xlu0 %2412, %v2846_v2   ;;  %v856_v0 = vld [vmem:[#allocation4 + $0x8] sm:$0xff] }
 0x1d1   : > { %v2859_v7 = vpop.f32.mrf.mxu0 }
 0x1d2   : > { %v840_v10 = vsel %vm694_vm2, %v2859_v7, -inf }
 0x1d3   : > { %841 = vmax.xlane.f32.xlu1 %v840_v10 }
 0x1d9   : > { %v919_v11 = vpop.f32.mrf.mxu0 }
 0x1e1   : > { %v922_v18 = vpop.f32.mrf.mxu0 }
 0x1e2   : > { %2250 = vmatpush.xpose.msk.msra.mxu2 %vm376_vm1, %v922_v18 }
 0x1e6   : > { %2251 = vmatpush.xpose.msk.msra.mxu2 %vm376_vm1, %v919_v11  ;;  %v2289_v11 = vld [vmem:[%s3349_s3 + $0xb8] sm:$0xff] }
 0x1e9   : > { %2252 = vmatmul.msk.f32.vlgmr.msra.gmra.mxu2 %vm376_vm1, %v954_v21 }
 0x1ea   : > { %1060 = vmatpush.msrb.mxu2 %v2257_v19 }
 0x1ec   : > { %1061 = vmatpush.msrb.mxu2 %v2256_v20 }
 0x1ee   : > { %1062 = vmatpush.msrb.mxu2 %v2255_v22 }
 0x1f0   : > { %1063 = vmatpush.msrb.mxu2 %v2254_v23 }
 0x1f1   : > { %2258 = vmatmul.msk.f32.vlgmr.msrb.gmra.mxu2 %vm351_vm0, %v2692_v13 }
 0x1f9   : > { %2259 = vmatmul.msk.f32.gmra.mxu2 %vm351_vm0, %v2696_v14 }
 0x226   : > { %v705_v31 = vpop.permute.xlu0 %704 }
 0x227   : > { %v707_v32 = vsub.f32 %v2766_v44, %v705_v31 }
 0x229   : > { %v708_v33 = vmul.f32 1.442695, %v707_v32 }
 0x22b   : > { %2416 = vpow2.f32 %v708_v33 }
 0x231   : > { %v2918_v34 = vpop.eup %2416 }
 0x232   : > { %2221 = vmatmul.msk.f32.vlgmr.msra.gmra.mxu3 %vm694_vm2, %v2918_v34 }
 0x23a   : > { %2232 = vmatmul.msk.f32.vlgmr.msrb.gmra.mxu3 %vm351_vm0, %v2692_v13 }
 0x242   : > { %2233 = vmatmul.msk.f32.gmra.mxu3 %vm351_vm0, %v2696_v14 }
 0x246   : > { %v842_v36 = vpop.xlane.xlu1 %841 }
 0x247   : > { %v2929_v37 = vmax.f32 %v2926_v35, %v842_v36 }
 0x249   : > { %v844_v38 = vsub.f32 %v2926_v35, %v2929_v37  ;;  %896 = vst.msk [vmem:[#allocation3 + $0x8] sm:$0xff] %vm574_vm3, %v2929_v37  ;;  %849 = vperm.xlu1 %2413, %v2929_v37  }
 0x26c   : > { %v2937_v41 = vpop.f32.mrf.mxu2 }
 0x26d   : > { %v986_v42 = vsel %vm694_vm2, %v2937_v41, -inf }
 0x26e   : > { %987 = vmax.xlane.f32.xlu2 %v986_v42  ;;  %v1392_v42 = vld [vmem:[#allocation2 + $0x28] sm:$0xff] }
 0x274   : > { %v1065_v43 = vpop.f32.mrf.mxu2 }
 0x27c   : > { %v1068_v44 = vpop.f32.mrf.mxu2 }
 0x27d   : > { %2266 = vmatpush.xpose.msk.msrb.mxu0 %vm376_vm1, %v1068_v44  ;;  %v2302_v44 = vld [vmem:[%s3349_s3 + $0xc0] sm:$0xff] }
 0x281   : > { %2267 = vmatpush.xpose.msk.msrb.mxu0 %vm376_vm1, %v1065_v43  ;;  %v2303_v43 = vld [vmem:[%s3349_s3 + $0xc8] sm:$0xff] }
 0x284   : > { %2268 = vmatmul.msk.f32.vlgmr.msrb.gmra.mxu0 %vm376_vm1, %v1100_v46 }
 0x285   : > { %1206 = vmatpush.msra.mxu0 %v2273_v45 }
 0x287   : > { %1207 = vmatpush.msra.mxu0 %v2272_v47 }
 0x289   : > { %1208 = vmatpush.msra.mxu0 %v2271_v48  ;;  %v2279_v48 = vld [vmem:[%s3350_s4 + $0x98] sm:$0xff] }
 0x28b   : > { %1209 = vmatpush.msra.mxu0 %v2270_v49  ;;  %v2278_v49 = vld [vmem:[%s3350_s4 + $0x90] sm:$0xff] }
 0x28c   : > { %2274 = vmatmul.msk.f32.vlgmr.msra.gmra.mxu0 %vm351_vm0, %v2692_v13 }
 0x294   : > { %2275 = vmatmul.msk.f32.gmra.mxu0 %vm351_vm0, %v2696_v14 }
 0x2b5   : > { %v2961_v52 = vpop.f32.mrf.mxu3 }
 0x2bb   : > { %v850_v53 = vpop.permute.xlu1 %849 }
 0x2bc   : > { %v852_v54 = vsub.f32 %v2859_v7, %v850_v53 }
 0x2bd   : > { %v801_v55 = vpop.f32.mrf.mxu3 }
 0x2be   : > { %v853_v56 = vmul.f32 1.442695, %v852_v54 }
 0x2c0   : > { %2418 = vpow2.f32 %v853_v56 }
 0x2c5   : > { %v804_v57 = vpop.f32.mrf.mxu3 }
 0x2c6   : > { %888 = vmatpush.msrb.mxu1 %v804_v57  ;;  %v2967_v59 = vpop.eup %2418  ;;  %v3096_v57 = vld [vmem:[#allocation3 + $0x20] sm:$0xff] }
 0x2c8   : > { %889 = vmatpush.msrb.mxu1 %v801_v55 }
 0x2c9   : > { %2237 = vmatmul.msk.f32.vlgmr.msrb.gmra.mxu1 %vm694_vm2, %v2967_v59 }
 0x2ca   : > { %942 = vmatpush.msra.mxu1 %v2247_v58 }
 0x2cc   : > { %943 = vmatpush.msra.mxu1 %v2246_v60 }
 0x2ce   : > { %944 = vmatpush.msra.mxu1 %v2245_v61 }
 0x2d0   : > { %945 = vmatpush.msra.mxu1 %v2244_v62 }
 0x2d1   : > { %2248 = vmatmul.msk.f32.vlgmr.msra.gmra.mxu1 %vm351_vm0, %v2692_v13 }
 0x2d9   : > { %2249 = vmatmul.msk.f32.gmra.mxu1 %vm351_vm0, %v2696_v14 }
 0x2e1   : > { %v988_v1 = vpop.xlane.xlu2 %987 }
 0x2e2   : > { %v2987_v5 = vmax.f32 %v2984_v63, %v988_v1 }
 0x2e4   : > { %v990_v6 = vsub.f32 %v2984_v63, %v2987_v5  ;;  %1042 = vst.msk [vmem:[#allocation3 + $0x10] sm:$0xff] %vm574_vm3, %v2987_v5  ;;  %995 = vperm.xlu2 %2414, %v2987_v5   ;;  %v710_v5 = vld [vmem:[#allocation4] sm:$0xff] }
 0x301   : > { %v2994_v7 = vpop.f32.mrf.mxu0 }
 0x302   : > { %v1132_v9 = vsel %vm694_vm2, %v2994_v7, -inf }
 0x309   : > { %v1211_v8 = vpop.f32.mrf.mxu0 }
 0x30d   : > { %1133 = vmax.xlane.f32.xlu2 %v1132_v9  ;;  %v2320_v9 = vld [vmem:[%s3349_s3 + $0xf0] sm:$0xff] }
 0x311   : > { %v1214_v10 = vpop.f32.mrf.mxu0 }
 0x312   : > { %2282 = vmatpush.xpose.msk.msra.mxu2 %vm376_vm1, %v1214_v10  ;;  %v1538_v10 = vld [vmem:[#allocation2 + $0x30] sm:$0xff] }
 0x316   : > { %2283 = vmatpush.xpose.msk.msra.mxu2 %vm376_vm1, %v1211_v8  ;;  %v2321_v8 = vld [vmem:[%s3349_s3 + $0xf8] sm:$0xff] }
 0x319   : > { %2284 = vmatmul.msk.f32.vlgmr.msra.gmra.mxu2 %vm376_vm1, %v1246_v15 }
 0x31a   : > { %1352 = vmatpush.msrb.mxu2 %v2289_v11  ;;  %v2319_v11 = vld [vmem:[%s3349_s3 + $0xe8] sm:$0xff] }
 0x31c   : > { %1353 = vmatpush.msrb.mxu2 %v2288_v12  ;;  %v2318_v12 = vld [vmem:[%s3349_s3 + $0xe0] sm:$0xff] }
 0x31e   : > { %1354 = vmatpush.msrb.mxu2 %v2287_v16 }
 0x320   : > { %1355 = vmatpush.msrb.mxu2 %v2286_v17 }
 0x321   : > { %2290 = vmatmul.msk.f32.vlgmr.msrb.gmra.mxu2 %vm351_vm0, %v2692_v13 }
 0x329   : > { %2291 = vmatmul.msk.f32.gmra.mxu2 %vm351_vm0, %v2696_v14 }
 0x33e   : > { %v996_v19 = vpop.permute.xlu2 %995 }
 0x33f   : > { %v998_v20 = vsub.f32 %v2937_v41, %v996_v19  ;;  %v2304_v41 = vld [vmem:[%s3349_s3 + $0xd0] sm:$0xff] }
 0x341   : > { %v999_v22 = vmul.f32 1.442695, %v998_v20  ;;  %v2295_v20 = vld [vmem:[%s3350_s4 + $0xb8] sm:$0xff] }
 0x343   : > { %2420 = vpow2.f32 %v999_v22  ;;  %v2293_v22 = vld [vmem:[%s3350_s4 + $0xa8] sm:$0xff] }
 0x346   : > { %v3017_v18 = vpop.f32.mrf.mxu1 }
 0x349   : > { %v3023_v25 = vpop.eup %2420 }
 0x34e   : > { %v947_v21 = vpop.f32.mrf.mxu1 }
 0x356   : > { %v950_v23 = vpop.f32.mrf.mxu1 }
 0x357   : > { %1034 = vmatpush.msra.mxu3 %v950_v23 }
 0x359   : > { %1035 = vmatpush.msra.mxu3 %v947_v21  ;;  %v2294_v21 = vld [vmem:[%s3350_s4 + $0xb0] sm:$0xff] }
 0x35a   : > { %2253 = vmatmul.msk.f32.vlgmr.msra.gmra.mxu3 %vm694_vm2, %v3023_v25 }
 0x35b   : > { %1088 = vmatpush.msrb.mxu3 %v2263_v24  ;;  %v2292_v24 = vld [vmem:[%s3350_s4 + $0xa0] sm:$0xff] }
 0x35d   : > { %1089 = vmatpush.msrb.mxu3 %v2262_v26 }
 0x35f   : > { %1090 = vmatpush.msrb.mxu3 %v2261_v27 }
 0x361   : > { %1091 = vmatpush.msrb.mxu3 %v2260_v28 }
 0x362   : > { %2264 = vmatmul.msk.f32.vlgmr.msrb.gmra.mxu3 %vm351_vm0, %v2692_v13 }
 0x36a   : > { %2265 = vmatmul.msk.f32.gmra.mxu3 %vm351_vm0, %v2696_v14 }
 0x380   : > { %v1134_v30 = vpop.xlane.xlu2 %1133 }
 0x381   : > { %v3043_v4 = vmax.f32 %v3040_v29, %v1134_v30  ;;  %v1423_v30 = vld [vmem:[#allocation3 + $0x28] sm:$0xff] }
 0x383   : > { %v1136_v31 = vsub.f32 %v3040_v29, %v3043_v4  ;;  %1188 = vst.msk [vmem:[#allocation3 + $0x18] sm:$0xff] %vm574_vm3, %v3043_v4  ;;  %1141 = vperm.xlu1 %2413, %v3043_v4  }
 0x39c   : > { %v3050_v32 = vpop.f32.mrf.mxu2 }
 0x39d   : > { %v1278_v39 = vsel %vm694_vm2, %v3050_v32, -inf }
 0x3a4   : > { %v1357_v33 = vpop.f32.mrf.mxu2 }
 0x3ac   : > { %v1360_v36 = vpop.f32.mrf.mxu2 }
 0x3ad   : > { %2298 = vmatpush.xpose.msk.msrb.mxu0 %vm376_vm1, %v1360_v36  ;;  %1279 = vmax.xlane.f32.xlu1 %v1278_v39 }
 0x3b1   : > { %2299 = vmatpush.xpose.msk.msrb.mxu0 %vm376_vm1, %v1357_v33 }
 0x3b4   : > { %2300 = vmatmul.msk.f32.vlgmr.msrb.gmra.mxu0 %vm376_vm1, %v1392_v42 }
 0x3b5   : > { %1498 = vmatpush.msra.mxu0 %v2305_v40 }
 0x3b7   : > { %1499 = vmatpush.msra.mxu0 %v2304_v41 }
 0x3b9   : > { %1500 = vmatpush.msra.mxu0 %v2303_v43  ;;  %v1684_v43 = vld [vmem:[#allocation2 + $0x38] sm:$0xff] }
 0x3bb   : > { %1501 = vmatpush.msra.mxu0 %v2302_v44 }
 0x3bc   : > { %2306 = vmatmul.msk.f32.vlgmr.msra.gmra.mxu0 %vm351_vm0, %v2692_v13 }
 0x3c4   : > { %2307 = vmatmul.msk.f32.gmra.mxu0 %vm351_vm0, %v2696_v14 }
 0x3dd   : > { %v3073_v45 = vpop.f32.mrf.mxu3 }
 0x3e5   : > { %v1093_v46 = vpop.f32.mrf.mxu3 }
 0x3ed   : > { %v1096_v47 = vpop.f32.mrf.mxu3 }
 0x3ee   : > { %1180 = vmatpush.msrb.mxu1 %v1096_v47 }
 0x3f0   : > { %1181 = vmatpush.msrb.mxu1 %v1093_v46 }
 0x3f2   : > { %1234 = vmatpush.msra.mxu1 %v2279_v48 }
 0x3f4   : > { %1235 = vmatpush.msra.mxu1 %v2278_v49 }
 0x3f5   : > { %v1142_v53 = vpop.permute.xlu1 %1141 }
 0x3f6   : > { %1236 = vmatpush.msra.mxu1 %v2277_v50  ;;  %v1144_v54 = vsub.f32 %v2994_v7, %v1142_v53 }
 0x3f8   : > { %1237 = vmatpush.msra.mxu1 %v2276_v51  ;;  %v1145_v55 = vmul.f32 1.442695, %v1144_v54  ;;  %v2311_v51 = vld [vmem:[%s3350_s4 + $0xd8] sm:$0xff]  ;;  %v2310_v54 = vld [vmem:[%s3350_s4 + $0xd0] sm:$0xff] }
 0x3fa   : > { %2422 = vpow2.f32 %v1145_v55  ;;  %v2309_v55 = vld [vmem:[%s3350_s4 + $0xc8] sm:$0xff] }
 0x400   : > { %v3088_v56 = vpop.eup %2422 }
 0x401   : > { %2269 = vmatmul.msk.f32.vlgmr.msrb.gmra.mxu1 %vm694_vm2, %v3088_v56 }
 0x409   : > { %2280 = vmatmul.msk.f32.vlgmr.msra.gmra.mxu1 %vm351_vm0, %v2692_v13 }
 0x411   : > { %2281 = vmatmul.msk.f32.gmra.mxu1 %vm351_vm0, %v2696_v14 }
 0x420   : > { %v1280_v58 = vpop.xlane.xlu1 %1279 }
 0x421   : > { %v3099_v60 = vmax.f32 %v3096_v57, %v1280_v58  ;;  %v2308_v58 = vld [vmem:[%s3350_s4 + $0xc0] sm:$0xff] }
 0x423   : > { %v1282_v61 = vsub.f32 %v3096_v57, %v3099_v60  ;;  %1334 = vst.msk [vmem:[#allocation3 + $0x20] sm:$0xff] %vm574_vm3, %v3099_v60  ;;  %1287 = vperm.xlu0 %2412, %v3099_v60  }
 0x425   : > { %v1283_v37 = vmul.f32 1.442695, %v1282_v61 }
 0x431   : > { %v1419_v62 = vpop.f32.mrf.mxu0 }
 0x432   : > { %v1424_v15 = vsel %vm694_vm2, %v1419_v62, -inf }
 0x439   : > { %v1503_v1 = vpop.f32.mrf.mxu0 }
 0x441   : > { %v1506_v7 = vpop.f32.mrf.mxu0 }
 0x442   : > { %2314 = vmatpush.xpose.msk.msra.mxu2 %vm376_vm1, %v1506_v7 }
 0x446   : > { %2315 = vmatpush.xpose.msk.msra.mxu2 %vm376_vm1, %v1503_v1 }
 0x449   : > { %2316 = vmatmul.msk.f32.vlgmr.msra.gmra.mxu2 %vm376_vm1, %v1538_v10 }
 0x44a   : > { %1644 = vmatpush.msrb.mxu2 %v2321_v8 }
 0x44c   : > { %1645 = vmatpush.msrb.mxu2 %v2320_v9 }
 0x44d   : > { %1425 = vmax.xlane.f32.xlu0 %v1424_v15  ;;  %v1150_v15 = vsel %vm694_vm2, %v3088_v56, 0.0 }
 0x44e   : > { %1646 = vmatpush.msrb.mxu2 %v2319_v11  ;;  %v858_v11 = vsel %vm694_vm2, %v2967_v59, 0.0 }
 0x450   : > { %1647 = vmatpush.msrb.mxu2 %v2318_v12  ;;  %v712_v12 = vsel %vm694_vm2, %v2918_v34, 0.0 }
 0x451   : > { %2322 = vmatmul.msk.f32.vlgmr.msrb.gmra.mxu2 %vm351_vm0, %v2692_v13 }
 0x459   : > { %2323 = vmatmul.msk.f32.gmra.mxu2 %vm351_vm0, %v2696_v14 }
 0x47e   : > { %v3126_v16 = vpop.f32.mrf.mxu1 }
 0x486   : > { %v1239_v17 = vpop.f32.mrf.mxu1 }
 0x48e   : > { %v1242_v19 = vpop.f32.mrf.mxu1 }
 0x48f   : > { %1326 = vmatpush.msra.mxu3 %v1242_v19 }
 0x491   : > { %1327 = vmatpush.msra.mxu3 %v1239_v17 }
 0x493   : > { %1380 = vmatpush.msrb.mxu3 %v2295_v20  ;;  %v1137_v20 = vmul.f32 1.442695, %v1136_v31  ;;  %v2327_v31 = vld [vmem:[%s3350_s4 + $0xf8] sm:$0xff] }
 0x495   : > { %1381 = vmatpush.msrb.mxu3 %v2294_v21  ;;  %v1288_v23 = vpop.permute.xlu0 %1287 }
 0x496   : > { %v1290_v26 = vsub.f32 %v3050_v32, %v1288_v23 }
 0x497   : > { %1382 = vmatpush.msrb.mxu3 %v2293_v22 }
 0x498   : > { %v1291_v27 = vmul.f32 1.442695, %v1290_v26 }
 0x499   : > { %1383 = vmatpush.msrb.mxu3 %v2292_v24 }
 0x49a   : > { %2424 = vpow2.f32 %v1291_v27 }
 0x4a0   : > { %v2425_v28 = vpop.eup %2424 }
 0x4a1   : > { %2285 = vmatmul.msk.f32.vlgmr.msra.gmra.mxu3 %vm694_vm2, %v2425_v28  ;;  %v1296_v17 = vsel %vm694_vm2, %v2425_v28, 0.0  ;;  %v2326_v28 = vld [vmem:[%s3350_s4 + $0xf0] sm:$0xff] }
 0x4a9   : > { %2296 = vmatmul.msk.f32.vlgmr.msrb.gmra.mxu3 %vm351_vm0, %v2692_v13 }
 0x4b1   : > { %2297 = vmatmul.msk.f32.gmra.mxu3 %vm351_vm0, %v2696_v14 }
 0x4c0   : > { %v1426_v33 = vpop.xlane.xlu0 %1425 }
 0x4c1   : > { %v1427_v36 = vmax.f32 %v1423_v30, %v1426_v33  ;;  %v2324_v33 = vld [vmem:[%s3350_s4 + $0xe0] sm:$0xff] }
 0x4c3   : > { %v1428_v39 = vsub.f32 %v1423_v30, %v1427_v36  ;;  %1480 = vst.msk [vmem:[#allocation3 + $0x28] sm:$0xff] %vm574_vm3, %v1427_v36  ;;  %1433 = vperm.xlu2 %2414, %v1427_v36   ;;  %v2325_v30 = vld [vmem:[%s3350_s4 + $0xe8] sm:$0xff]  ;;  %v845_v36 = vmul.f32 1.442695, %v844_v38 }
 0x4c5   : > { %v1429_v59 = vmul.f32 1.442695, %v1428_v39  ;;  %v991_v39 = vmul.f32 1.442695, %v990_v6 }
 0x4cc   : > { %v1565_v32 = vpop.f32.mrf.mxu2 }
 0x4cd   : > { %v1570_v40 = vsel %vm694_vm2, %v1565_v32, -inf }
 0x4ce   : > { %1571 = vmax.xlane.f32.xlu1 %v1570_v40  ;;  %v3225_v40 = vld [vmem:[#allocation3 + $0x38] sm:$0xff] }
 0x4d4   : > { %v1649_v41 = vpop.f32.mrf.mxu2 }
 0x4dc   : > { %v1652_v42 = vpop.f32.mrf.mxu2 }
 0x4dd   : > { %2330 = vmatpush.xpose.msk.msrb.mxu0 %vm376_vm1, %v1652_v42 }
 0x4e1   : > { %2331 = vmatpush.xpose.msk.msrb.mxu0 %vm376_vm1, %v1649_v41 }
 0x4e4   : > { %2332 = vmatmul.msk.f32.vlgmr.msrb.gmra.mxu0 %vm376_vm1, %v1684_v43 }
 0x51d   : > { %v1434_v46 = vpop.permute.xlu2 %1433 }
 0x51e   : > { %v1436_v47 = vsub.f32 %v1419_v62, %v1434_v46  ;;  %v3166_v62 = vld [vmem:[#allocation3 + $0x30] sm:$0xff]  ;;  %v1148_v46 = vld [vmem:[#allocation4 + $0x18] sm:$0xff] }
 0x520   : > { %v1437_v49 = vmul.f32 1.442695, %v1436_v47  ;;  %v1294_v47 = vld [vmem:[#allocation4 + $0x20] sm:$0xff] }
 0x522   : > { %2426 = vpow2.f32 %v1437_v49 }
 0x523   : > { %2428 = vpow2.f32 %v1137_v20 }
 0x524   : > { %v3151_v44 = vpop.f32.mrf.mxu3  ;;  %2430 = vpow2.f32 %v1429_v59 }
 0x528   : > { %v2427_v53 = vpop.eup %2426 }
 0x529   : > { %v1442_v19 = vsel %vm694_vm2, %v2427_v53, 0.0  ;;  %v2429_v21 = vpop.eup %2428 }
 0x52a   : > { %v3195_v34 = vpop.eup %2430 }
 0x52c   : > { %v1385_v48 = vpop.f32.mrf.mxu3 }
 0x534   : > { %v1388_v50 = vpop.f32.mrf.mxu3 }
 0x535   : > { %1472 = vmatpush.msrb.mxu1 %v1388_v50 }
 0x537   : > { %1473 = vmatpush.msrb.mxu1 %v1385_v48 }
 0x538   : > { %2301 = vmatmul.msk.f32.vlgmr.msrb.gmra.mxu1 %vm694_vm2, %v2427_v53 }
 0x539   : > { %1526 = vmatpush.msra.mxu1 %v2311_v51 }
 0x53b   : > { %1527 = vmatpush.msra.mxu1 %v2310_v54  ;;  %v1440_v54 = vld [vmem:[#allocation4 + $0x28] sm:$0xff] }
 0x53d   : > { %1528 = vmatpush.msra.mxu1 %v2309_v55  ;;  %v1441_v55 = vmul.f32 %v3195_v34, %v1440_v54  ;;  %v2334_v54 = vld [vmem:[%s3351_s5 + $0x8] sm:$0xff] }
 0x53e   : > { %1815 = vmatpush.msra.mxu0 %v2334_v54 }
 0x53f   : > { %1529 = vmatpush.msra.mxu1 %v2308_v58 }
 0x540   : > { %2312 = vmatmul.msk.f32.vlgmr.msra.gmra.mxu1 %vm351_vm0, %v2692_v13 }
 0x541   : > { %v1572_v1 = vpop.xlane.xlu1 %1571 }
 0x542   : > { %v3171_v7 = vmax.f32 %v3166_v62, %v1572_v1 }
 0x544   : > { %v1574_v8 = vsub.f32 %v3166_v62, %v3171_v7  ;;  %1626 = vst.msk [vmem:[#allocation3 + $0x30] sm:$0xff] %vm574_vm3, %v3171_v7  ;;  %1579 = vperm.xlu1 %2413, %v3171_v7   ;;  %v1010_v62 = vld [vmem:[#allocation5 + $0x10] sm:$0xff] }
 0x548   : > { %2313 = vmatmul.msk.f32.gmra.mxu1 %vm351_vm0, %v2696_v14 }
 0x561   : > { %v3180_v9 = vpop.f32.mrf.mxu0 }
 0x562   : > { %v1716_v10 = vsel %vm694_vm2, %v3180_v9, -inf }
 0x563   : > { %1717 = vmax.xlane.f32.xlu2 %v1716_v10 }
 0x56b   : > { %859 = vadd.xlane.f32.xlu2 %v858_v11 }
 0x56e   : > { %713 = vadd.xlane.f32.xlu1 %v712_v12 }
 0x573   : > { %1151 = vadd.xlane.f32.xlu2 %v1150_v15 }
 0x576   : > { %1297 = vadd.xlane.f32.xlu1 %v1296_v17  ;;  %v1004_v17 = vsel %vm694_vm2, %v3023_v25, 0.0  ;;  %v1575_v25 = vmul.f32 1.442695, %v1574_v8 }
 0x57e   : > { %1443 = vadd.xlane.f32.xlu1 %v1442_v19  ;;  %v1156_v19 = vld [vmem:[#allocation5 + $0x18] sm:$0xff] }
 0x597   : > { %1159 = vperm.xlu1 %2413, %v2429_v21  }
 0x59f   : > { %1451 = vperm.xlu1 %2413, %v3195_v34   ;;  %v1448_v34 = vld [vmem:[#allocation5 + $0x28] sm:$0xff] }
 0x5b5   : > { %v3198_v56 = vpop.f32.mrf.mxu1 }
 0x5b6   : > { %v1580_v22 = vpop.permute.xlu1 %1579 }
 0x5b7   : > { %v1582_v23 = vsub.f32 %v1565_v32, %v1580_v22  ;;  %v700_v32 = vmul.f32 1.442695, %v699_v3 }
 0x5b9   : > { %v1583_v24 = vmul.f32 1.442695, %v1582_v23 }
 0x5bb   : > { %2432 = vpow2.f32 %v1583_v24 }
 0x5bc   : > { %2434 = vpow2.f32 %v845_v36 }
 0x5bd   : > { %v1531_v26 = vpop.f32.mrf.mxu1  ;;  %2436 = vpow2.f32 %v991_v39  ;;  %v1302_v39 = vld [vmem:[#allocation5 + $0x20] sm:$0xff] }
 0x5be   : > { %2438 = vpow2.f32 %v700_v32 }
 0x5bf   : > { %2440 = vpow2.f32 %v1283_v37 }
 0x5c1   : > { %v2433_v27 = vpop.eup %2432 }
 0x5c2   : > { %v1588_v29 = vsel %vm694_vm2, %v2433_v27, 0.0  ;;  %v2435_v38 = vpop.eup %2434 }
 0x5c3   : > { %1589 = vadd.xlane.f32.xlu2 %v1588_v29  ;;  %v857_v3 = vmul.f32 %v2435_v38, %v856_v0 }
 0x5c5   : > { %v1534_v4 = vpop.f32.mrf.mxu1 }
 0x5c6   : > { %1618 = vmatpush.msra.mxu3 %v1534_v4 }
 0x5c8   : > { %1619 = vmatpush.msra.mxu3 %v1531_v26 }
 0x5c9   : > { %2317 = vmatmul.msk.f32.vlgmr.msra.gmra.mxu3 %vm694_vm2, %v2433_v27 }
 0x5ca   : > { %1672 = vmatpush.msrb.mxu3 %v2327_v31 }
 0x5cc   : > { %1673 = vmatpush.msrb.mxu3 %v2326_v28 }
 0x5ce   : > { %1674 = vmatpush.msrb.mxu3 %v2325_v30 }
 0x5d0   : > { %1675 = vmatpush.msrb.mxu3 %v2324_v33 }
 0x5d1   : > { %2328 = vmatmul.msk.f32.vlgmr.msrb.gmra.mxu3 %vm351_vm0, %v2692_v13  ;;  %v3235_v13 = vpop.eup %2436 }
 0x5d2   : > { %v2439_v2 = vpop.eup %2438 }
 0x5d3   : > { %v711_v60 = vmul.f32 %v2439_v2, %v710_v5  ;;  %v2441_v42 = vpop.eup %2440 }
 0x5d4   : > { %v1295_v50 = vmul.f32 %v2441_v42, %v1294_v47 }
 0x5d6   : > { %v1718_v41 = vpop.xlane.xlu2 %1717 }
 0x5d7   : > { %v1719_v35 = vmax.f32 %v3225_v40, %v1718_v41 }
 0x5d9   : > { %v1720_v63 = vsub.f32 %v3225_v40, %v1719_v35  ;;  %1772 = vst.msk [vmem:[#allocation3 + $0x38] sm:$0xff] %vm574_vm3, %v1719_v35  ;;  %2329 = vmatmul.msk.f32.gmra.mxu3 %vm351_vm0, %v2696_v14  ;;  %1725 = vperm.xlu0 %2412, %v1719_v35   ;;  %v1149_v14 = vmul.f32 %v2429_v21, %v1148_v46 }
 0x5db   : > { %1013 = vperm.xlu2 %2414, %v3235_v13   ;;  %v1721_v26 = vmul.f32 1.442695, %v1720_v63  ;;  %v2339_v63 = vld [vmem:[%s3351_s5 + $0x18] sm:$0xff] }
 0x5dc   : > { %1907 = vmatpush.msra.mxu3 %v2339_v63 }
 0x5de   : > { %v860_v6 = vpop.xlane.xlu2 %859 }
 0x5df   : > { %v861_v57 = vadd.f32 %v860_v6, %v857_v3 }
 0x5e1   : > { %862 = vst.msk [vmem:[#allocation4 + $0x8] sm:$0xff] %vm574_vm3, %v861_v57  ;;  %v714_v61 = vpop.xlane.xlu1 %713 }
 0x5e2   : > { %v715_v43 = vadd.f32 %v714_v61, %v711_v60 }
 0x5e3   : > { %1305 = vperm.xlu2 %2414, %v2441_v42  }
 0x5e4   : > { %717 = vst.msk [vmem:[#allocation4] sm:$0xff] %vm574_vm3, %v715_v43 }
 0x5e6   : > { %v1152_v48 = vpop.xlane.xlu2 %1151 }
 0x5e7   : > { %v1153_v49 = vadd.f32 %v1152_v48, %v1149_v14 }
 0x5e9   : > { %1154 = vst.msk [vmem:[#allocation4 + $0x18] sm:$0xff] %vm574_vm3, %v1153_v49  ;;  %v1298_v51 = vpop.xlane.xlu1 %1297 }
 0x5ea   : > { %v1299_v53 = vadd.f32 %v1298_v51, %v1295_v50  ;;  %v718_v50 = vld [vmem:[#allocation5] sm:$0xff] }
 0x5eb   : > { %v1776_v48 = vld [vmem:[#allocation4] sm:$0xff] }
 0x5ec   : > { %1300 = vst.msk [vmem:[#allocation4 + $0x20] sm:$0xff] %vm574_vm3, %v1299_v53 }
 0x5f0   : > { %v1878_v58 = vld [vmem:[#allocation4 + $0x18] sm:$0xff] }
 0x5f1   : > { %v1444_v1 = vpop.xlane.xlu1 %1443  ;;  %2442 = vrcp.f32 %v1878_v58 }
 0x5f2   : > { %v1445_v10 = vadd.f32 %v1444_v1, %v1441_v55  ;;  %v2341_v55 = vld [vmem:[%s3351_s5 + $0x20] sm:$0xff]  ;;  %v864_v1 = vld [vmem:[#allocation5 + $0x8] sm:$0xff] }
 0x5f3   : > { %v1913_v11 = vld [vmem:[#allocation4 + $0x20] sm:$0xff]  ;;  %1942 = vmatpush.msrb.mxu0 %v2341_v55 }
 0x5f4   : > { %1446 = vst.msk [vmem:[#allocation4 + $0x28] sm:$0xff] %vm574_vm3, %v1445_v10  ;;  %2444 = vrcp.f32 %v1913_v11 }
 0x5f5   : > { %2446 = vpow2.f32 %v1575_v25  ;;  %v1732_v25 = vld [vmem:[#allocation4 + $0x38] sm:$0xff] }
 0x5f6   : > { %2448 = vpow2.f32 %v1721_v26 }
 0x5f7   : > { %v2443_v12 = vpop.eup %2442 }
 0x5f8   : > { %1883 = vperm.xlu1 %2413, %v2443_v12  }
 0x5fa   : > { %v2445_v15 = vpop.eup %2444 }
 0x5fb   : > { %v2447_v27 = vpop.eup %2446  ;;  %v1948_v40 = vld [vmem:[#allocation4 + $0x28] sm:$0xff] }
 0x5fc   : > { %v3253_v29 = vpop.eup %2448 }
 0x5fd   : > { %v1733_v26 = vmul.f32 %v3253_v29, %v1732_v25 }
 0x600   : > { %1918 = vperm.xlu1 %2413, %v2445_v15   ;;  %v1594_v15 = vld [vmem:[#allocation5 + $0x30] sm:$0xff] }
 0x603   : > { %1005 = vadd.xlane.f32.xlu0 %v1004_v17 }
 0x609   : > { %v1160_v20 = vpop.permute.xlu1 %1159 }
 0x60a   : > { %v1162_v59 = vmul.f32 %v1160_v20, %v1156_v19 }
 0x60c   : > { %v1186_v21 = vadd.f32 %v3126_v16, %v1162_v59  ;;  %v1786_v16 = vld [vmem:[#allocation4 + $0x8] sm:$0xff] }
 0x60d   : > { %2450 = vrcp.f32 %v1786_v16  ;;  %v1785_v16 = vld [vmem:[%s3351_s5] sm:$0xff] }
 0x60e   : > { %1187 = vst.msk [vmem:[#allocation5 + $0x18] sm:$0xff] %vm376_vm1, %v1186_v21 }
 0x611   : > { %v1452_v22 = vpop.permute.xlu1 %1451 }
 0x612   : > { %v1454_v23 = vmul.f32 %v1452_v22, %v1448_v34 }
 0x613   : > { %v2451_v31 = vpop.eup %2450 }
 0x614   : > { %v1478_v24 = vadd.f32 %v3198_v56, %v1454_v23  ;;  %v1586_v56 = vld [vmem:[#allocation4 + $0x30] sm:$0xff] }
 0x615   : > { %v1587_v4 = vmul.f32 %v2447_v27, %v1586_v56  ;;  %v1880_v60 = vld [vmem:[#allocation5 + $0x18] sm:$0xff]  ;;  %v2345_v56 = vld [vmem:[%s3351_s5 + $0x30] sm:$0xff] }
 0x616   : > { %1479 = vst.msk [vmem:[#allocation5 + $0x28] sm:$0xff] %vm376_vm1, %v1478_v24 }
 0x617   : > { %721 = vperm.xlu0 %2412, %v2439_v2  }
 0x61f   : > { %867 = vperm.xlu0 %2412, %v2435_v38  }
 0x627   : > { %1597 = vperm.xlu0 %2412, %v2447_v27  }
 0x62f   : > { %1743 = vperm.xlu0 %2412, %v3253_v29  }
 0x636   : > { %v1590_v28 = vpop.xlane.xlu2 %1589 }
 0x637   : > { %v1591_v30 = vadd.f32 %v1590_v28, %v1587_v4  ;;  %1791 = vperm.xlu0 %2412, %v2451_v31   ;;  %v2343_v31 = vld [vmem:[%s3351_s5 + $0x28] sm:$0xff]  ;;  %v1740_v28 = vld [vmem:[#allocation5 + $0x38] sm:$0xff] }
 0x639   : > { %1592 = vst.msk [vmem:[#allocation4 + $0x30] sm:$0xff] %vm574_vm3, %v1591_v30 }
 0x63e   : > { %v1014_v7 = vpop.permute.xlu2 %1013 }
 0x63f   : > { %v1016_v8 = vmul.f32 %v1014_v7, %v1010_v62 }
 0x640   : > { %v1983_v33 = vld [vmem:[#allocation4 + $0x30] sm:$0xff] }
 0x641   : > { %v1040_v36 = vadd.f32 %v3073_v45, %v1016_v8  ;;  %2452 = vrcp.f32 %v1983_v33 }
 0x642   : > { %2454 = vrcp.f32 %v1948_v40 }
 0x643   : > { %1041 = vst.msk [vmem:[#allocation5 + $0x10] sm:$0xff] %vm376_vm1, %v1040_v36 }
 0x646   : > { %v1306_v32 = vpop.permute.xlu2 %1305 }
 0x647   : > { %v2453_v41 = vpop.eup %2452  ;;  %v1308_v35 = vmul.f32 %v1306_v32, %v1302_v39 }
 0x648   : > { %1988 = vperm.xlu0 %2412, %v2453_v41   ;;  %v2455_v3 = vpop.eup %2454 }
 0x649   : > { %v1332_v37 = vadd.f32 %v3151_v44, %v1308_v35 }
 0x64a   : > { %v1845_v33 = vld [vmem:[#allocation5 + $0x10] sm:$0xff] }
 0x64b   : > { %1333 = vst.msk [vmem:[#allocation5 + $0x20] sm:$0xff] %vm376_vm1, %v1332_v37  ;;  %v1726_v38 = vpop.permute.xlu0 %1725 }
 0x64c   : > { %v1728_v45 = vsub.f32 %v3180_v9, %v1726_v38  ;;  %v1621_v0 = vpop.f32.mrf.mxu3  ;;  %v1002_v9 = vld [vmem:[#allocation4 + $0x10] sm:$0xff] }
 0x64d   : > { %v1003_v43 = vmul.f32 %v3235_v13, %v1002_v9 }
 0x64e   : > { %v1729_v2 = vmul.f32 1.442695, %v1728_v45  ;;  %v1950_v45 = vld [vmem:[#allocation5 + $0x28] sm:$0xff] }
 0x650   : > { %2456 = vpow2.f32 %v1729_v2  ;;  %1953 = vperm.xlu0 %2412, %v2455_v3   ;;  %v2347_v2 = vld [vmem:[%s3351_s5 + $0x38] sm:$0xff] }
 0x651   : > { %2047 = vmatpush.msrb.mxu3 %v2347_v2 }
 0x652   : > { %v1915_v23 = vld [vmem:[#allocation5 + $0x20] sm:$0xff] }
 0x654   : > { %v1677_v5 = vpop.f32.mrf.mxu3 }
 0x656   : > { %v2457_v6 = vpop.eup %2456 }
 0x657   : > { %v1734_v44 = vsel %vm694_vm2, %v2457_v6, 0.0 }
 0x658   : > { %1735 = vadd.xlane.f32.xlu2 %v1734_v44 }
 0x65c   : > { %v1680_v57 = vpop.f32.mrf.mxu3 }
 0x65d   : > { %1764 = vmatpush.msrb.mxu1 %v1680_v57 }
 0x65f   : > { %1765 = vmatpush.msrb.mxu1 %v1677_v5 }
 0x660   : > { %2333 = vmatmul.msk.f32.vlgmr.msrb.gmra.mxu1 %vm694_vm2, %v2457_v6 }
 0x661   : > { %1838 = vmatpush.msra.mxu1 %v1785_v16 }
 0x663   : > { %1977 = vmatpush.msrb.mxu1 %v2343_v31 }
 0x66a   : > { %v1884_v61 = vpop.permute.xlu1 %1883 }
 0x66b   : > { %v1886_v42 = vmul.f32 %v1884_v61, %v1880_v60 }
 0x66d   : > { %2340 = vmatmul.msk.f32.vlgmr.msra.gmra.mxu3 %vm376_vm1, %v1886_v42 }
 0x672   : > { %v1919_v22 = vpop.permute.xlu1 %1918 }
 0x673   : > { %v1921_v24 = vmul.f32 %v1919_v22, %v1915_v23 }
 0x676   : > { %v1006_v46 = vpop.xlane.xlu0 %1005 }
 0x677   : > { %v1007_v14 = vadd.f32 %v1006_v46, %v1003_v43 }
 0x679   : > { %1008 = vst.msk [vmem:[#allocation4 + $0x10] sm:$0xff] %vm574_vm3, %v1007_v14 }
 0x680   : > { %v1843_v47 = vld [vmem:[#allocation4 + $0x10] sm:$0xff] }
 0x681   : > { %2458 = vrcp.f32 %v1843_v47 }
 0x682   : > { %2460 = vrcp.f32 %v1776_v48 }
 0x687   : > { %v2459_v49 = vpop.eup %2458 }
 0x688   : > { %1848 = vperm.xlu2 %2414, %v2459_v49   ;;  %v2461_v58 = vpop.eup %2460 }
 0x689   : > { %v722_v51 = vpop.permute.xlu0 %721 }
 0x68a   : > { %v724_v53 = vmul.f32 %v722_v51, %v718_v50  ;;  %v2415_v51 = vld [vmem:[%s3352_s6] ss:$0 sm:$0xff] }
 0x68c   : > { %v748_v13 = vadd.f32 %v2961_v52, %v724_v53 }
 0x68e   : > { %749 = vst.msk [vmem:[#allocation5] sm:$0xff] %vm376_vm1, %v748_v13 }
 0x690   : > { %1781 = vperm.xlu2 %2414, %v2461_v58  }
 0x691   : > { %v868_v10 = vpop.permute.xlu0 %867 }
 0x692   : > { %v870_v11 = vmul.f32 %v868_v10, %v864_v1 }
 0x694   : > { %v894_v12 = vadd.f32 %v3017_v18, %v870_v11  ;;  %v2337_v18 = vld [vmem:[%s3351_s5 + $0x10] sm:$0xff] }
 0x695   : > { %1872 = vmatpush.msra.mxu2 %v2337_v18  ;;  %v1778_v41 = vld [vmem:[#allocation5] sm:$0xff] }
 0x696   : > { %895 = vst.msk [vmem:[#allocation5 + $0x8] sm:$0xff] %vm376_vm1, %v894_v12 }
 0x697   : > { %2012 = vmatpush.msrb.mxu2 %v2345_v56 }
 0x699   : > { %v1598_v17 = vpop.permute.xlu0 %1597 }
 0x69a   : > { %v1600_v19 = vmul.f32 %v1598_v17, %v1594_v15 }
 0x69c   : > { %v1624_v52 = vadd.f32 %v1621_v0, %v1600_v19 }
 0x69d   : > { %v1788_v59 = vld [vmem:[#allocation5 + $0x8] sm:$0xff] }
 0x69e   : > { %1625 = vst.msk [vmem:[#allocation5 + $0x30] sm:$0xff] %vm376_vm1, %v1624_v52 }
 0x6a1   : > { %v1744_v20 = vpop.permute.xlu0 %1743 }
 0x6a2   : > { %v1746_v62 = vmul.f32 %v1744_v20, %v1740_v28 }
 0x6a5   : > { %v1985_v40 = vld [vmem:[#allocation5 + $0x30] sm:$0xff] }
 0x6a9   : > { %v1792_v21 = vpop.permute.xlu0 %1791 }
 0x6aa   : > { %v1794_v34 = vmul.f32 %v1792_v21, %v1788_v59 }
 0x6ac   : > { %2335 = vmatmul.msk.f32.vlgmr.msra.gmra.mxu0 %vm376_vm1, %v1794_v34 }
 0x6b4   : > { %2342 = vmatmul.msk.f32.vlgmr.msrb.gmra.mxu0 %vm376_vm1, %v1921_v24 }
 0x6ba   : > { %v1989_v32 = vpop.permute.xlu0 %1988 }
 0x6bb   : > { %v1991_v37 = vmul.f32 %v1989_v32, %v1985_v40 }
 0x6c2   : > { %v1954_v63 = vpop.permute.xlu0 %1953 }
 0x6c3   : > { %v1956_v0 = vmul.f32 %v1954_v63, %v1950_v45 }
 0x6cb   : > { %v1736_v27 = vpop.xlane.xlu2 %1735 }
 0x6cc   : > { %v1737_v4 = vadd.f32 %v1736_v27, %v1733_v26 }
 0x6ce   : > { %1738 = vst.msk [vmem:[#allocation4 + $0x38] sm:$0xff] %vm574_vm3, %v1737_v4 }
 0x6d5   : > { %v2018_v29 = vld [vmem:[#allocation4 + $0x38] sm:$0xff] }
 0x6d6   : > { %2462 = vrcp.f32 %v2018_v29 }
 0x6dc   : > { %v2463_v30 = vpop.eup %2462 }
 0x6dd   : > { %v1767_v7 = vpop.f32.mrf.mxu1  ;;  %2023 = vperm.xlu2 %2414, %v2463_v30  }
 0x6de   : > { %v1770_v8 = vadd.f32 %v1767_v7, %v1746_v62 }
 0x6e0   : > { %1771 = vst.msk [vmem:[#allocation5 + $0x38] sm:$0xff] %vm376_vm1, %v1770_v8 }
 0x6e2   : > { %v1849_v36 = vpop.permute.xlu2 %1848 }
 0x6e3   : > { %v1851_v39 = vmul.f32 %v1849_v36, %v1845_v33 }
 0x6e5   : > { %2338 = vmatmul.msk.f32.vlgmr.msra.gmra.mxu2 %vm376_vm1, %v1851_v39 }
 0x6e7   : > { %v2020_v3 = vld [vmem:[#allocation5 + $0x38] sm:$0xff] }
 0x6ea   : > { %v1782_v35 = vpop.permute.xlu2 %1781 }
 0x6eb   : > { %v1784_v38 = vmul.f32 %v1782_v35, %v1778_v41 }
 0x6ed   : > { %2336 = vmatmul.msk.f32.vlgmr.msra.gmra.mxu1 %vm376_vm1, %v1784_v38  ;;  %2346 = vmatmul.msk.f32.vlgmr.msrb.gmra.mxu2 %vm376_vm1, %v1991_v37 }
 0x6f0   : > { %v1909_v9 = vpop.f32.mrf.mxu3 }
 0x6f5   : > { %2344 = vmatmul.msk.f32.vlgmr.msrb.gmra.mxu1 %vm376_vm1, %v1956_v0 }
 0x729   : > { %v1817_v57 = vpop.f32.mrf.mxu0 }
 0x731   : > { %v1944_v46 = vpop.f32.mrf.mxu0 }
 0x737   : > { %v2024_v5 = vpop.permute.xlu2 %2023 }
 0x738   : > { %v2026_v6 = vmul.f32 %v2024_v5, %v2020_v3 }
 0x73a   : > { %2348 = vmatmul.msk.f32.vlgmr.msrb.gmra.mxu3 %vm376_vm1, %v2026_v6 }
 0x768   : > { %v1874_v61 = vpop.f32.mrf.mxu2 }
 0x76a   : > { %v1840_v44 = vpop.f32.mrf.mxu1 }
 0x76b   : > { %v1841_v60 = vadd.f32 %v1840_v44, %v1817_v57 }
 0x76d   : > { %v1877_v42 = vadd.f32 %v1874_v61, %v1841_v60 }
 0x76f   : > { %v1912_v43 = vadd.f32 %v1909_v9, %v1877_v42 }
 0x770   : > { %v2014_v49 = vpop.f32.mrf.mxu2 }
 0x771   : > { %v1947_v14 = vadd.f32 %v1944_v46, %v1912_v43 }
 0x772   : > { %v1979_v47 = vpop.f32.mrf.mxu1 }
 0x773   : > { %v1982_v48 = vadd.f32 %v1979_v47, %v1947_v14 }
 0x775   : > { %v2017_v50 = vadd.f32 %v2014_v49, %v1982_v48 }
 0x7bd   : > { %v2049_v53 = vpop.f32.mrf.mxu3 }
 0x7be   : > { %v2052_v54 = vadd.f32 %v2049_v53, %v2017_v50 }
 0x7c0   : > { %v2057_v13 = vadd.f32 %v2415_v51, %v2052_v54 }
 0x7c2   : > { %2059 = vst.msk [vmem:[%s324_s20] sm:$0xff] %vm2058_vm4, %v2057_v13 }
 0x7c3   : > { %2491 = shalt.err (!%p2488_p5)
}
 0x7c4   : > { %2354 = dma.vmem_to_hbm [thread:$0]  (%p2627_p4), %s2075_s22, 128, %s2077_s21, %s2061_s27  }
 0x7c5 PF: > { %p2360_p6 = scmp.ge.s32.totalorder %s2542_s29, 2  ;;  %s2088_s8 = sand.u32 1, %s2522_s24  }
 0x7c6   : > { %s2089_s18 = scalar_lea.sflag [#allocation7], %s2088_s8 }
 0x7c7   : > { %p2357_p7 = pnand %p2360_p6, %p2634_p8 }
 0x7c9   : > { %p2358_p9 = pneg %p2357_p7 }
 0x7cb   : > { %2517 = dma.done.wait (%p2358_p9), %s2089_s18, 128  }
 0x7cc   : > { %2519 = vsyncadd (%p2358_p9), %s2089_s18, 4294967168  ;;  %s20_s29 = sadd.s32 1, %s2542_s29   ;;  %s3356_s24 = smov %s2526_s25 }
 0x7cd   : > { %p17_p10 = scmp.ge.s32.totalorder %s20_s29, 4   ;;  %s3357_s25 = smov %s2530_s26 }
 0x7ce   : > { %s3358_s26 = smov %s2640_s14  ;;  %s3359_s27 = smov %s2538_s28 }
 0x7cf   : > { %s3360_s28 = smov %s3362_s9  ;;  %19 = sbr.rel (!%p17_p10) target bundleno = 4 (0x4), region = 157 }
 0x7d4   :  { %2095 = vsyncpa [#allocation7], 1 }
 0x7d5   :  { %2097 = vsyncpa [#allocation7 + $0x1], 1 }

</bundles_post_ra>
